<compile_context>
chip_gen: v7x
topology: tpu7x:2x2x1
jax: 0.10.0
libtpu: 0.0.40
codegen_flags: <defaults>
</compile_context>

<pallas_src>
import math
from functools import partial

import jax
import jax.numpy as jnp
from jax.experimental import pallas as pl
from jax.experimental.pallas import tpu as pltpu


# ---------------------------------------------------------------------------
# Deterministic parameter construction (mirrors FractalNeuralOperator.__init__)
# ---------------------------------------------------------------------------
def fractal_transform(dim: int) -> jnp.ndarray:
    """_initialize_fractal_transform(): sin(2*pi*R) * cos(3*Theta) on a [-0.5,0.5]^2 grid."""
    d = min(dim, 64)
    xs = jnp.linspace(-0.5, 0.5, d)
    ys = jnp.linspace(-0.5, 0.5, d)
    X, Y = jnp.meshgrid(xs, ys, indexing="ij")
    R = jnp.sqrt(X ** 2 + Y ** 2)
    Theta = jnp.arctan2(Y, X)
    return (jnp.sin(R * 2.0 * jnp.pi) * jnp.cos(Theta * 3.0)).astype(jnp.float32)


# ---------------------------------------------------------------------------
# Pallas kernel: one grid step, whole (B*L, D) problem resident in VMEM.
# ---------------------------------------------------------------------------
def _fractal_attention_kernel(x_ref, wqkv_ref, wot_ref, bo_ref, o_ref,
                              *, batch: int, seq: int, dim: int,
                              num_heads: int, head_dim: int):
    rows = batch * seq

    # Fused QKV projection over all B*L rows: one MXU pass, bf16 operands, f32 accumulate.
    qkv = jnp.dot(x_ref[...], wqkv_ref[...],
                  preferred_element_type=jnp.float32)              # (B*L, 3D) f32

    acc = jnp.zeros((rows, dim), jnp.float32)                      # out_proj accumulator
    for h in range(num_heads):                                     # static unroll (H=8)
        c = h * head_dim
        # (B*L, hd) -> (B, L, hd): leading-dim split, layout-preserving.
        qh = qkv[:, c:c + head_dim].reshape(batch, seq, head_dim).astype(jnp.bfloat16)
        kh = qkv[:, dim + c:dim + c + head_dim].reshape(batch, seq, head_dim).astype(jnp.bfloat16)
        vh = qkv[:, 2 * dim + c:2 * dim + c + head_dim].reshape(batch, seq, head_dim).astype(jnp.bfloat16)

        # scores, batched over B (1/sqrt(hd) already baked into the q weights)
        s = jnp.einsum("bqd,bkd->bqk", qh, kh,
                       preferred_element_type=jnp.float32)         # (B, L, L) f32
        # safe softmax over keys, strictly f32
        s = s - jnp.max(s, axis=-1, keepdims=True)
        p = jnp.exp(s)
        p = p * pl.reciprocal(jnp.sum(p, axis=-1, keepdims=True), approx=True)

        oh = jnp.einsum("bqk,bkd->bqd", p.astype(jnp.bfloat16), vh,
                        preferred_element_type=jnp.float32)        # (B, L, hd) f32

        # fold out_proj per head: acc += o_h @ W^T[h*hd:(h+1)*hd, :]   (no lane concat)
        acc = acc + jnp.dot(oh.reshape(rows, head_dim).astype(jnp.bfloat16),
                            wot_ref[h],
                            preferred_element_type=jnp.float32)    # (B*L, D) f32

    o_ref[...] = acc + bo_ref[...]                                 # bias add, f32 store


# ---------------------------------------------------------------------------
# Wrapper
# ---------------------------------------------------------------------------
def fractal_attention(x, t_q, t_k, t_v, w_out, b_out, num_heads: int):
    B, L, D = x.shape
    assert D % num_heads == 0
    hd = D // num_heads
    scale = 1.0 / math.sqrt(hd)

    # Fused projection weight [t_q * scale | t_k | t_v], bf16 for the MXU.
    wqkv = jnp.concatenate(
        [jnp.asarray(t_q, jnp.float32) * scale,
         jnp.asarray(t_k, jnp.float32),
         jnp.asarray(t_v, jnp.float32)], axis=1).astype(jnp.bfloat16)        # (D, 3D)
    # out_proj weight: W^T split per head -> (H, hd, D), bf16.
    wot = jnp.asarray(w_out, jnp.float32).T.reshape(num_heads, hd, D).astype(jnp.bfloat16)
    b_row = jnp.asarray(b_out, jnp.float32).reshape(1, D)
    x_flat = jnp.asarray(x, jnp.float32).reshape(B * L, D).astype(jnp.bfloat16)

    kernel = partial(_fractal_attention_kernel, batch=B, seq=L, dim=D,
                     num_heads=num_heads, head_dim=hd)

    out_flat = pl.pallas_call(
        kernel,
        out_shape=jax.ShapeDtypeStruct((B * L, D), jnp.float32),
        grid=(1,),
        in_specs=[
            pl.BlockSpec((B * L, D), lambda i: (0, 0)),             # activations (bf16)
            pl.BlockSpec((D, 3 * D), lambda i: (0, 0)),             # fused QKV weight
            pl.BlockSpec((num_heads, hd, D), lambda i: (0, 0, 0)),  # out_proj W^T per head
            pl.BlockSpec((1, D), lambda i: (0, 0)),                 # out_proj bias (f32)
        ],
        out_specs=pl.BlockSpec((B * L, D), lambda i: (0, 0)),
        compiler_params=pltpu.CompilerParams(
            dimension_semantics=("arbitrary",),
            vmem_limit_bytes=32 * 1024 * 1024,
        ),
    )(x_flat, wqkv, wot, b_row)
    return out_flat.reshape(B, L, D)


# ---------------------------------------------------------------------------
# Pure-JAX f32 reference (module semantics)
# ---------------------------------------------------------------------------
def fractal_attention_ref(x, t_q, t_k, t_v, w_out, b_out, num_heads: int):
    B, L, D = x.shape
    hd = D // num_heads
    q = (x @ t_q).reshape(B, L, num_heads, hd).transpose(0, 2, 1, 3)
    k = (x @ t_k).reshape(B, L, num_heads, hd).transpose(0, 2, 1, 3)
    v = (x @ t_v).reshape(B, L, num_heads, hd).transpose(0, 2, 1, 3)
    s = jnp.einsum("bhld,bhmd->bhlm", q, k) / math.sqrt(hd)
    p = jax.nn.softmax(s, axis=-1)
    o = jnp.einsum("bhlm,bhmd->bhld", p, v).transpose(0, 2, 1, 3).reshape(B, L, D)
    return o @ w_out.T + b_out


if __name__ == "__main__":
    B, L, D, H = 2, 8, 32, 8       # dim=32 (<=64) so transform is (D, D), matching the module

    key = jax.random.PRNGKey(0)
    kx, kw, kb, kq, kk, kv = jax.random.split(key, 6)

    x = jax.random.normal(kx, (B, L, D), dtype=jnp.float32)

    # Deterministic fractal init (identical for q/k/v in the module) plus small per-operator
    # perturbations so the self-check can actually catch q/k/v wiring or transpose mistakes.
    base = fractal_transform(D)
    t_q = base + 0.1 * jax.random.normal(kq, (D, D), jnp.float32)
    t_k = base + 0.1 * jax.random.normal(kk, (D, D), jnp.float32)
    t_v = base + 0.1 * jax.random.normal(kv, (D, D), jnp.float32)

    # out_proj = nn.Linear(D, D): uniform(-1/sqrt(D), 1/sqrt(D)) weight + bias
    bound = 1.0 / math.sqrt(D)
    w_out = jax.random.uniform(kw, (D, D), jnp.float32, -bound, bound)
    b_out = jax.random.uniform(kb, (D,), jnp.float32, -bound, bound)

    out = jax.block_until_ready(
        fractal_attention(x, t_q, t_k, t_v, w_out, b_out, num_heads=H))
    ref = fractal_attention_ref(x, t_q, t_k, t_v, w_out, b_out, num_heads=H)

    assert out.shape == (B, L, D)
    rel = jnp.sqrt(jnp.sum((out - ref) ** 2) / (jnp.sum(ref ** 2) + 1e-12))
    assert float(rel) < 5e-2, f"mismatch vs reference: rel={float(rel):.4g}"
    print("KERNEL_OK")
</pallas_src>

<mosaic_0001>
module attributes {stable_mosaic.version = 11 : i64} {
  func.func @_fractal_attention_kernel(%arg0: i32, %arg1: memref<16x32xbf16, #tpu.memory_space<vmem>>, %arg2: memref<32x96xbf16, #tpu.memory_space<vmem>>, %arg3: memref<8x4x32xbf16, #tpu.memory_space<vmem>>, %arg4: memref<1x32xf32, #tpu.memory_space<vmem>>, %arg5: memref<16x32xf32, #tpu.memory_space<vmem>>) attributes {dimension_semantics = [#tpu.dimension_semantics<arbitrary>], iteration_bounds = array<i64: 1>, scalar_prefetch = 0 : i64, scratch_operands = 0 : i64, tpu.core_type = #tpu.core_type<tc>, window_params = [{pipeline_mode = #tpu.pipeline_mode<synchronous>, transform_indices = @transform_0, window_bounds = array<i64: 16, 32>}, {pipeline_mode = #tpu.pipeline_mode<synchronous>, transform_indices = @transform_1, window_bounds = array<i64: 32, 96>}, {pipeline_mode = #tpu.pipeline_mode<synchronous>, transform_indices = @transform_2, window_bounds = array<i64: 8, 4, 32>}, {pipeline_mode = #tpu.pipeline_mode<synchronous>, transform_indices = @transform_3, window_bounds = array<i64: 1, 32>}, {pipeline_mode = #tpu.pipeline_mode<synchronous>, transform_indices = @transform_4, window_bounds = array<i64: 16, 32>}]} {
    %c0 = arith.constant 0 : index
    %c0_0 = arith.constant 0 : index
    %0 = vector.load %arg1[%c0, %c0_0] : memref<16x32xbf16, #tpu.memory_space<vmem>>, vector<16x32xbf16>
    %c0_1 = arith.constant 0 : index
    %c0_2 = arith.constant 0 : index
    %1 = vector.load %arg2[%c0_1, %c0_2] : memref<32x96xbf16, #tpu.memory_space<vmem>>, vector<32x96xbf16>
    %cst = arith.constant dense<0.000000e+00> : vector<16x96xf32>
    %2 = tpu.matmul %0, %1, %cst {dimension_numbers = #tpu.dot_dimension_numbers<[1], [0], [0], [1], [0, 0, 1, 1], [], []>} : vector<16x32xbf16>, vector<32x96xbf16>, vector<16x96xf32> -> vector<16x96xf32>
    %cst_3 = arith.constant 0.000000e+00 : f32
    %3 = vector.broadcast %cst_3 : f32 to vector<16x32xf32>
    %4 = vector.extract_strided_slice %2 {offsets = [0, 0], sizes = [16, 4], strides = [1, 1]} : vector<16x96xf32> to vector<16x4xf32>
    %5 = vector.shape_cast %4 : vector<16x4xf32> to vector<2x8x4xf32>
    %6 = arith.truncf %5 : vector<2x8x4xf32> to vector<2x8x4xbf16>
    %7 = vector.extract_strided_slice %2 {offsets = [0, 32], sizes = [16, 4], strides = [1, 1]} : vector<16x96xf32> to vector<16x4xf32>
    %8 = vector.shape_cast %7 : vector<16x4xf32> to vector<2x8x4xf32>
    %9 = arith.truncf %8 : vector<2x8x4xf32> to vector<2x8x4xbf16>
    %10 = vector.extract_strided_slice %2 {offsets = [0, 64], sizes = [16, 4], strides = [1, 1]} : vector<16x96xf32> to vector<16x4xf32>
    %11 = vector.shape_cast %10 : vector<16x4xf32> to vector<2x8x4xf32>
    %12 = arith.truncf %11 : vector<2x8x4xf32> to vector<2x8x4xbf16>
    "tpu.trace_start"() <{level = 10 : i32, message = "bqd,bkd->bqk"}> : () -> ()
    %cst_4 = arith.constant dense<0.000000e+00> : vector<2x8x8xf32>
    %13 = tpu.matmul %6, %9, %cst_4 {dimension_numbers = #tpu.dot_dimension_numbers<[2], [2], [1], [1], [0, 0, 0, 1, 1, 1], [0], [0]>} : vector<2x8x4xbf16>, vector<2x8x4xbf16>, vector<2x8x8xf32> -> vector<2x8x8xf32>
    "tpu.trace_stop"() : () -> ()
    %cst_5 = arith.constant dense<0xFF800000> : vector<2x8xf32>
    %14 = vector.multi_reduction <maximumf>, %13, %cst_5 [2] : vector<2x8x8xf32> to vector<2x8xf32>
    %15 = vector.shape_cast %14 : vector<2x8xf32> to vector<2x8x1xf32>
    %16 = vector.broadcast %15 : vector<2x8x1xf32> to vector<2x8x8xf32>
    %17 = arith.subf %13, %16 : vector<2x8x8xf32>
    %18 = math.exp %17 : vector<2x8x8xf32>
    %cst_6 = arith.constant dense<0.000000e+00> : vector<2x8xf32>
    %19 = vector.multi_reduction <add>, %18, %cst_6 [2] : vector<2x8x8xf32> to vector<2x8xf32>
    %20 = vector.shape_cast %19 : vector<2x8xf32> to vector<2x8x1xf32>
    %21 = tpu.reciprocal %20 {approx = true} : vector<2x8x1xf32> -> vector<2x8x1xf32>
    %22 = vector.broadcast %21 : vector<2x8x1xf32> to vector<2x8x8xf32>
    %23 = arith.mulf %18, %22 : vector<2x8x8xf32>
    %24 = arith.truncf %23 : vector<2x8x8xf32> to vector<2x8x8xbf16>
    "tpu.trace_start"() <{level = 10 : i32, message = "bqk,bkd->bqd"}> : () -> ()
    %cst_7 = arith.constant dense<0.000000e+00> : vector<2x8x4xf32>
    %25 = tpu.matmul %24, %12, %cst_7 {dimension_numbers = #tpu.dot_dimension_numbers<[2], [1], [1], [2], [0, 0, 0, 1, 1, 2], [0], [0]>} : vector<2x8x8xbf16>, vector<2x8x4xbf16>, vector<2x8x4xf32> -> vector<2x8x4xf32>
    "tpu.trace_stop"() : () -> ()
    %26 = vector.shape_cast %25 : vector<2x8x4xf32> to vector<16x4xf32>
    %27 = arith.truncf %26 : vector<16x4xf32> to vector<16x4xbf16>
    %c0_8 = arith.constant 0 : index
    %c0_9 = arith.constant 0 : index
    %c0_10 = arith.constant 0 : index
    %28 = vector.load %arg3[%c0_8, %c0_9, %c0_10] : memref<8x4x32xbf16, #tpu.memory_space<vmem>>, vector<1x4x32xbf16>
    %29 = vector.shape_cast %28 : vector<1x4x32xbf16> to vector<4x32xbf16>
    %cst_11 = arith.constant dense<0.000000e+00> : vector<16x32xf32>
    %30 = tpu.matmul %27, %29, %cst_11 {dimension_numbers = #tpu.dot_dimension_numbers<[1], [0], [0], [1], [0, 0, 1, 1], [], []>} : vector<16x4xbf16>, vector<4x32xbf16>, vector<16x32xf32> -> vector<16x32xf32>
    %31 = arith.addf %3, %30 : vector<16x32xf32>
    %32 = vector.extract_strided_slice %2 {offsets = [0, 4], sizes = [16, 4], strides = [1, 1]} : vector<16x96xf32> to vector<16x4xf32>
    %33 = vector.shape_cast %32 : vector<16x4xf32> to vector<2x8x4xf32>
    %34 = arith.truncf %33 : vector<2x8x4xf32> to vector<2x8x4xbf16>
    %35 = vector.extract_strided_slice %2 {offsets = [0, 36], sizes = [16, 4], strides = [1, 1]} : vector<16x96xf32> to vector<16x4xf32>
    %36 = vector.shape_cast %35 : vector<16x4xf32> to vector<2x8x4xf32>
    %37 = arith.truncf %36 : vector<2x8x4xf32> to vector<2x8x4xbf16>
    %38 = vector.extract_strided_slice %2 {offsets = [0, 68], sizes = [16, 4], strides = [1, 1]} : vector<16x96xf32> to vector<16x4xf32>
    %39 = vector.shape_cast %38 : vector<16x4xf32> to vector<2x8x4xf32>
    %40 = arith.truncf %39 : vector<2x8x4xf32> to vector<2x8x4xbf16>
    "tpu.trace_start"() <{level = 10 : i32, message = "bqd,bkd->bqk"}> : () -> ()
    %cst_12 = arith.constant dense<0.000000e+00> : vector<2x8x8xf32>
    %41 = tpu.matmul %34, %37, %cst_12 {dimension_numbers = #tpu.dot_dimension_numbers<[2], [2], [1], [1], [0, 0, 0, 1, 1, 1], [0], [0]>} : vector<2x8x4xbf16>, vector<2x8x4xbf16>, vector<2x8x8xf32> -> vector<2x8x8xf32>
    "tpu.trace_stop"() : () -> ()
    %cst_13 = arith.constant dense<0xFF800000> : vector<2x8xf32>
    %42 = vector.multi_reduction <maximumf>, %41, %cst_13 [2] : vector<2x8x8xf32> to vector<2x8xf32>
    %43 = vector.shape_cast %42 : vector<2x8xf32> to vector<2x8x1xf32>
    %44 = vector.broadcast %43 : vector<2x8x1xf32> to vector<2x8x8xf32>
    %45 = arith.subf %41, %44 : vector<2x8x8xf32>
    %46 = math.exp %45 : vector<2x8x8xf32>
    %cst_14 = arith.constant dense<0.000000e+00> : vector<2x8xf32>
    %47 = vector.multi_reduction <add>, %46, %cst_14 [2] : vector<2x8x8xf32> to vector<2x8xf32>
    %48 = vector.shape_cast %47 : vector<2x8xf32> to vector<2x8x1xf32>
    %49 = tpu.reciprocal %48 {approx = true} : vector<2x8x1xf32> -> vector<2x8x1xf32>
    %50 = vector.broadcast %49 : vector<2x8x1xf32> to vector<2x8x8xf32>
    %51 = arith.mulf %46, %50 : vector<2x8x8xf32>
    %52 = arith.truncf %51 : vector<2x8x8xf32> to vector<2x8x8xbf16>
    "tpu.trace_start"() <{level = 10 : i32, message = "bqk,bkd->bqd"}> : () -> ()
    %cst_15 = arith.constant dense<0.000000e+00> : vector<2x8x4xf32>
    %53 = tpu.matmul %52, %40, %cst_15 {dimension_numbers = #tpu.dot_dimension_numbers<[2], [1], [1], [2], [0, 0, 0, 1, 1, 2], [0], [0]>} : vector<2x8x8xbf16>, vector<2x8x4xbf16>, vector<2x8x4xf32> -> vector<2x8x4xf32>
    "tpu.trace_stop"() : () -> ()
    %54 = vector.shape_cast %53 : vector<2x8x4xf32> to vector<16x4xf32>
    %55 = arith.truncf %54 : vector<16x4xf32> to vector<16x4xbf16>
    %c1 = arith.constant 1 : index
    %c0_16 = arith.constant 0 : index
    %c0_17 = arith.constant 0 : index
    %56 = vector.load %arg3[%c1, %c0_16, %c0_17] : memref<8x4x32xbf16, #tpu.memory_space<vmem>>, vector<1x4x32xbf16>
    %57 = vector.shape_cast %56 : vector<1x4x32xbf16> to vector<4x32xbf16>
    %cst_18 = arith.constant dense<0.000000e+00> : vector<16x32xf32>
    %58 = tpu.matmul %55, %57, %cst_18 {dimension_numbers = #tpu.dot_dimension_numbers<[1], [0], [0], [1], [0, 0, 1, 1], [], []>} : vector<16x4xbf16>, vector<4x32xbf16>, vector<16x32xf32> -> vector<16x32xf32>
    %59 = arith.addf %31, %58 : vector<16x32xf32>
    %60 = vector.extract_strided_slice %2 {offsets = [0, 8], sizes = [16, 4], strides = [1, 1]} : vector<16x96xf32> to vector<16x4xf32>
    %61 = vector.shape_cast %60 : vector<16x4xf32> to vector<2x8x4xf32>
    %62 = arith.truncf %61 : vector<2x8x4xf32> to vector<2x8x4xbf16>
    %63 = vector.extract_strided_slice %2 {offsets = [0, 40], sizes = [16, 4], strides = [1, 1]} : vector<16x96xf32> to vector<16x4xf32>
    %64 = vector.shape_cast %63 : vector<16x4xf32> to vector<2x8x4xf32>
    %65 = arith.truncf %64 : vector<2x8x4xf32> to vector<2x8x4xbf16>
    %66 = vector.extract_strided_slice %2 {offsets = [0, 72], sizes = [16, 4], strides = [1, 1]} : vector<16x96xf32> to vector<16x4xf32>
    %67 = vector.shape_cast %66 : vector<16x4xf32> to vector<2x8x4xf32>
    %68 = arith.truncf %67 : vector<2x8x4xf32> to vector<2x8x4xbf16>
    "tpu.trace_start"() <{level = 10 : i32, message = "bqd,bkd->bqk"}> : () -> ()
    %cst_19 = arith.constant dense<0.000000e+00> : vector<2x8x8xf32>
    %69 = tpu.matmul %62, %65, %cst_19 {dimension_numbers = #tpu.dot_dimension_numbers<[2], [2], [1], [1], [0, 0, 0, 1, 1, 1], [0], [0]>} : vector<2x8x4xbf16>, vector<2x8x4xbf16>, vector<2x8x8xf32> -> vector<2x8x8xf32>
    "tpu.trace_stop"() : () -> ()
    %cst_20 = arith.constant dense<0xFF800000> : vector<2x8xf32>
    %70 = vector.multi_reduction <maximumf>, %69, %cst_20 [2] : vector<2x8x8xf32> to vector<2x8xf32>
    %71 = vector.shape_cast %70 : vector<2x8xf32> to vector<2x8x1xf32>
    %72 = vector.broadcast %71 : vector<2x8x1xf32> to vector<2x8x8xf32>
    %73 = arith.subf %69, %72 : vector<2x8x8xf32>
    %74 = math.exp %73 : vector<2x8x8xf32>
    %cst_21 = arith.constant dense<0.000000e+00> : vector<2x8xf32>
    %75 = vector.multi_reduction <add>, %74, %cst_21 [2] : vector<2x8x8xf32> to vector<2x8xf32>
    %76 = vector.shape_cast %75 : vector<2x8xf32> to vector<2x8x1xf32>
    %77 = tpu.reciprocal %76 {approx = true} : vector<2x8x1xf32> -> vector<2x8x1xf32>
    %78 = vector.broadcast %77 : vector<2x8x1xf32> to vector<2x8x8xf32>
    %79 = arith.mulf %74, %78 : vector<2x8x8xf32>
    %80 = arith.truncf %79 : vector<2x8x8xf32> to vector<2x8x8xbf16>
    "tpu.trace_start"() <{level = 10 : i32, message = "bqk,bkd->bqd"}> : () -> ()
    %cst_22 = arith.constant dense<0.000000e+00> : vector<2x8x4xf32>
    %81 = tpu.matmul %80, %68, %cst_22 {dimension_numbers = #tpu.dot_dimension_numbers<[2], [1], [1], [2], [0, 0, 0, 1, 1, 2], [0], [0]>} : vector<2x8x8xbf16>, vector<2x8x4xbf16>, vector<2x8x4xf32> -> vector<2x8x4xf32>
    "tpu.trace_stop"() : () -> ()
    %82 = vector.shape_cast %81 : vector<2x8x4xf32> to vector<16x4xf32>
    %83 = arith.truncf %82 : vector<16x4xf32> to vector<16x4xbf16>
    %c2 = arith.constant 2 : index
    %c0_23 = arith.constant 0 : index
    %c0_24 = arith.constant 0 : index
    %84 = vector.load %arg3[%c2, %c0_23, %c0_24] : memref<8x4x32xbf16, #tpu.memory_space<vmem>>, vector<1x4x32xbf16>
    %85 = vector.shape_cast %84 : vector<1x4x32xbf16> to vector<4x32xbf16>
    %cst_25 = arith.constant dense<0.000000e+00> : vector<16x32xf32>
    %86 = tpu.matmul %83, %85, %cst_25 {dimension_numbers = #tpu.dot_dimension_numbers<[1], [0], [0], [1], [0, 0, 1, 1], [], []>} : vector<16x4xbf16>, vector<4x32xbf16>, vector<16x32xf32> -> vector<16x32xf32>
    %87 = arith.addf %59, %86 : vector<16x32xf32>
    %88 = vector.extract_strided_slice %2 {offsets = [0, 12], sizes = [16, 4], strides = [1, 1]} : vector<16x96xf32> to vector<16x4xf32>
    %89 = vector.shape_cast %88 : vector<16x4xf32> to vector<2x8x4xf32>
    %90 = arith.truncf %89 : vector<2x8x4xf32> to vector<2x8x4xbf16>
    %91 = vector.extract_strided_slice %2 {offsets = [0, 44], sizes = [16, 4], strides = [1, 1]} : vector<16x96xf32> to vector<16x4xf32>
    %92 = vector.shape_cast %91 : vector<16x4xf32> to vector<2x8x4xf32>
    %93 = arith.truncf %92 : vector<2x8x4xf32> to vector<2x8x4xbf16>
    %94 = vector.extract_strided_slice %2 {offsets = [0, 76], sizes = [16, 4], strides = [1, 1]} : vector<16x96xf32> to vector<16x4xf32>
    %95 = vector.shape_cast %94 : vector<16x4xf32> to vector<2x8x4xf32>
    %96 = arith.truncf %95 : vector<2x8x4xf32> to vector<2x8x4xbf16>
    "tpu.trace_start"() <{level = 10 : i32, message = "bqd,bkd->bqk"}> : () -> ()
    %cst_26 = arith.constant dense<0.000000e+00> : vector<2x8x8xf32>
    %97 = tpu.matmul %90, %93, %cst_26 {dimension_numbers = #tpu.dot_dimension_numbers<[2], [2], [1], [1], [0, 0, 0, 1, 1, 1], [0], [0]>} : vector<2x8x4xbf16>, vector<2x8x4xbf16>, vector<2x8x8xf32> -> vector<2x8x8xf32>
    "tpu.trace_stop"() : () -> ()
    %cst_27 = arith.constant dense<0xFF800000> : vector<2x8xf32>
    %98 = vector.multi_reduction <maximumf>, %97, %cst_27 [2] : vector<2x8x8xf32> to vector<2x8xf32>
    %99 = vector.shape_cast %98 : vector<2x8xf32> to vector<2x8x1xf32>
    %100 = vector.broadcast %99 : vector<2x8x1xf32> to vector<2x8x8xf32>
    %101 = arith.subf %97, %100 : vector<2x8x8xf32>
    %102 = math.exp %101 : vector<2x8x8xf32>
    %cst_28 = arith.constant dense<0.000000e+00> : vector<2x8xf32>
    %103 = vector.multi_reduction <add>, %102, %cst_28 [2] : vector<2x8x8xf32> to vector<2x8xf32>
    %104 = vector.shape_cast %103 : vector<2x8xf32> to vector<2x8x1xf32>
    %105 = tpu.reciprocal %104 {approx = true} : vector<2x8x1xf32> -> vector<2x8x1xf32>
    %106 = vector.broadcast %105 : vector<2x8x1xf32> to vector<2x8x8xf32>
    %107 = arith.mulf %102, %106 : vector<2x8x8xf32>
    %108 = arith.truncf %107 : vector<2x8x8xf32> to vector<2x8x8xbf16>
    "tpu.trace_start"() <{level = 10 : i32, message = "bqk,bkd->bqd"}> : () -> ()
    %cst_29 = arith.constant dense<0.000000e+00> : vector<2x8x4xf32>
    %109 = tpu.matmul %108, %96, %cst_29 {dimension_numbers = #tpu.dot_dimension_numbers<[2], [1], [1], [2], [0, 0, 0, 1, 1, 2], [0], [0]>} : vector<2x8x8xbf16>, vector<2x8x4xbf16>, vector<2x8x4xf32> -> vector<2x8x4xf32>
    "tpu.trace_stop"() : () -> ()
    %110 = vector.shape_cast %109 : vector<2x8x4xf32> to vector<16x4xf32>
    %111 = arith.truncf %110 : vector<16x4xf32> to vector<16x4xbf16>
    %c3 = arith.constant 3 : index
    %c0_30 = arith.constant 0 : index
    %c0_31 = arith.constant 0 : index
    %112 = vector.load %arg3[%c3, %c0_30, %c0_31] : memref<8x4x32xbf16, #tpu.memory_space<vmem>>, vector<1x4x32xbf16>
    %113 = vector.shape_cast %112 : vector<1x4x32xbf16> to vector<4x32xbf16>
    %cst_32 = arith.constant dense<0.000000e+00> : vector<16x32xf32>
    %114 = tpu.matmul %111, %113, %cst_32 {dimension_numbers = #tpu.dot_dimension_numbers<[1], [0], [0], [1], [0, 0, 1, 1], [], []>} : vector<16x4xbf16>, vector<4x32xbf16>, vector<16x32xf32> -> vector<16x32xf32>
    %115 = arith.addf %87, %114 : vector<16x32xf32>
    %116 = vector.extract_strided_slice %2 {offsets = [0, 16], sizes = [16, 4], strides = [1, 1]} : vector<16x96xf32> to vector<16x4xf32>
    %117 = vector.shape_cast %116 : vector<16x4xf32> to vector<2x8x4xf32>
    %118 = arith.truncf %117 : vector<2x8x4xf32> to vector<2x8x4xbf16>
    %119 = vector.extract_strided_slice %2 {offsets = [0, 48], sizes = [16, 4], strides = [1, 1]} : vector<16x96xf32> to vector<16x4xf32>
    %120 = vector.shape_cast %119 : vector<16x4xf32> to vector<2x8x4xf32>
    %121 = arith.truncf %120 : vector<2x8x4xf32> to vector<2x8x4xbf16>
    %122 = vector.extract_strided_slice %2 {offsets = [0, 80], sizes = [16, 4], strides = [1, 1]} : vector<16x96xf32> to vector<16x4xf32>
    %123 = vector.shape_cast %122 : vector<16x4xf32> to vector<2x8x4xf32>
    %124 = arith.truncf %123 : vector<2x8x4xf32> to vector<2x8x4xbf16>
    "tpu.trace_start"() <{level = 10 : i32, message = "bqd,bkd->bqk"}> : () -> ()
    %cst_33 = arith.constant dense<0.000000e+00> : vector<2x8x8xf32>
    %125 = tpu.matmul %118, %121, %cst_33 {dimension_numbers = #tpu.dot_dimension_numbers<[2], [2], [1], [1], [0, 0, 0, 1, 1, 1], [0], [0]>} : vector<2x8x4xbf16>, vector<2x8x4xbf16>, vector<2x8x8xf32> -> vector<2x8x8xf32>
    "tpu.trace_stop"() : () -> ()
    %cst_34 = arith.constant dense<0xFF800000> : vector<2x8xf32>
    %126 = vector.multi_reduction <maximumf>, %125, %cst_34 [2] : vector<2x8x8xf32> to vector<2x8xf32>
    %127 = vector.shape_cast %126 : vector<2x8xf32> to vector<2x8x1xf32>
    %128 = vector.broadcast %127 : vector<2x8x1xf32> to vector<2x8x8xf32>
    %129 = arith.subf %125, %128 : vector<2x8x8xf32>
    %130 = math.exp %129 : vector<2x8x8xf32>
    %cst_35 = arith.constant dense<0.000000e+00> : vector<2x8xf32>
    %131 = vector.multi_reduction <add>, %130, %cst_35 [2] : vector<2x8x8xf32> to vector<2x8xf32>
    %132 = vector.shape_cast %131 : vector<2x8xf32> to vector<2x8x1xf32>
    %133 = tpu.reciprocal %132 {approx = true} : vector<2x8x1xf32> -> vector<2x8x1xf32>
    %134 = vector.broadcast %133 : vector<2x8x1xf32> to vector<2x8x8xf32>
    %135 = arith.mulf %130, %134 : vector<2x8x8xf32>
    %136 = arith.truncf %135 : vector<2x8x8xf32> to vector<2x8x8xbf16>
    "tpu.trace_start"() <{level = 10 : i32, message = "bqk,bkd->bqd"}> : () -> ()
    %cst_36 = arith.constant dense<0.000000e+00> : vector<2x8x4xf32>
    %137 = tpu.matmul %136, %124, %cst_36 {dimension_numbers = #tpu.dot_dimension_numbers<[2], [1], [1], [2], [0, 0, 0, 1, 1, 2], [0], [0]>} : vector<2x8x8xbf16>, vector<2x8x4xbf16>, vector<2x8x4xf32> -> vector<2x8x4xf32>
    "tpu.trace_stop"() : () -> ()
    %138 = vector.shape_cast %137 : vector<2x8x4xf32> to vector<16x4xf32>
    %139 = arith.truncf %138 : vector<16x4xf32> to vector<16x4xbf16>
    %c4 = arith.constant 4 : index
    %c0_37 = arith.constant 0 : index
    %c0_38 = arith.constant 0 : index
    %140 = vector.load %arg3[%c4, %c0_37, %c0_38] : memref<8x4x32xbf16, #tpu.memory_space<vmem>>, vector<1x4x32xbf16>
    %141 = vector.shape_cast %140 : vector<1x4x32xbf16> to vector<4x32xbf16>
    %cst_39 = arith.constant dense<0.000000e+00> : vector<16x32xf32>
    %142 = tpu.matmul %139, %141, %cst_39 {dimension_numbers = #tpu.dot_dimension_numbers<[1], [0], [0], [1], [0, 0, 1, 1], [], []>} : vector<16x4xbf16>, vector<4x32xbf16>, vector<16x32xf32> -> vector<16x32xf32>
    %143 = arith.addf %115, %142 : vector<16x32xf32>
    %144 = vector.extract_strided_slice %2 {offsets = [0, 20], sizes = [16, 4], strides = [1, 1]} : vector<16x96xf32> to vector<16x4xf32>
    %145 = vector.shape_cast %144 : vector<16x4xf32> to vector<2x8x4xf32>
    %146 = arith.truncf %145 : vector<2x8x4xf32> to vector<2x8x4xbf16>
    %147 = vector.extract_strided_slice %2 {offsets = [0, 52], sizes = [16, 4], strides = [1, 1]} : vector<16x96xf32> to vector<16x4xf32>
    %148 = vector.shape_cast %147 : vector<16x4xf32> to vector<2x8x4xf32>
    %149 = arith.truncf %148 : vector<2x8x4xf32> to vector<2x8x4xbf16>
    %150 = vector.extract_strided_slice %2 {offsets = [0, 84], sizes = [16, 4], strides = [1, 1]} : vector<16x96xf32> to vector<16x4xf32>
    %151 = vector.shape_cast %150 : vector<16x4xf32> to vector<2x8x4xf32>
    %152 = arith.truncf %151 : vector<2x8x4xf32> to vector<2x8x4xbf16>
    "tpu.trace_start"() <{level = 10 : i32, message = "bqd,bkd->bqk"}> : () -> ()
    %cst_40 = arith.constant dense<0.000000e+00> : vector<2x8x8xf32>
    %153 = tpu.matmul %146, %149, %cst_40 {dimension_numbers = #tpu.dot_dimension_numbers<[2], [2], [1], [1], [0, 0, 0, 1, 1, 1], [0], [0]>} : vector<2x8x4xbf16>, vector<2x8x4xbf16>, vector<2x8x8xf32> -> vector<2x8x8xf32>
    "tpu.trace_stop"() : () -> ()
    %cst_41 = arith.constant dense<0xFF800000> : vector<2x8xf32>
    %154 = vector.multi_reduction <maximumf>, %153, %cst_41 [2] : vector<2x8x8xf32> to vector<2x8xf32>
    %155 = vector.shape_cast %154 : vector<2x8xf32> to vector<2x8x1xf32>
    %156 = vector.broadcast %155 : vector<2x8x1xf32> to vector<2x8x8xf32>
    %157 = arith.subf %153, %156 : vector<2x8x8xf32>
    %158 = math.exp %157 : vector<2x8x8xf32>
    %cst_42 = arith.constant dense<0.000000e+00> : vector<2x8xf32>
    %159 = vector.multi_reduction <add>, %158, %cst_42 [2] : vector<2x8x8xf32> to vector<2x8xf32>
    %160 = vector.shape_cast %159 : vector<2x8xf32> to vector<2x8x1xf32>
    %161 = tpu.reciprocal %160 {approx = true} : vector<2x8x1xf32> -> vector<2x8x1xf32>
    %162 = vector.broadcast %161 : vector<2x8x1xf32> to vector<2x8x8xf32>
    %163 = arith.mulf %158, %162 : vector<2x8x8xf32>
    %164 = arith.truncf %163 : vector<2x8x8xf32> to vector<2x8x8xbf16>
    "tpu.trace_start"() <{level = 10 : i32, message = "bqk,bkd->bqd"}> : () -> ()
    %cst_43 = arith.constant dense<0.000000e+00> : vector<2x8x4xf32>
    %165 = tpu.matmul %164, %152, %cst_43 {dimension_numbers = #tpu.dot_dimension_numbers<[2], [1], [1], [2], [0, 0, 0, 1, 1, 2], [0], [0]>} : vector<2x8x8xbf16>, vector<2x8x4xbf16>, vector<2x8x4xf32> -> vector<2x8x4xf32>
    "tpu.trace_stop"() : () -> ()
    %166 = vector.shape_cast %165 : vector<2x8x4xf32> to vector<16x4xf32>
    %167 = arith.truncf %166 : vector<16x4xf32> to vector<16x4xbf16>
    %c5 = arith.constant 5 : index
    %c0_44 = arith.constant 0 : index
    %c0_45 = arith.constant 0 : index
    %168 = vector.load %arg3[%c5, %c0_44, %c0_45] : memref<8x4x32xbf16, #tpu.memory_space<vmem>>, vector<1x4x32xbf16>
    %169 = vector.shape_cast %168 : vector<1x4x32xbf16> to vector<4x32xbf16>
    %cst_46 = arith.constant dense<0.000000e+00> : vector<16x32xf32>
    %170 = tpu.matmul %167, %169, %cst_46 {dimension_numbers = #tpu.dot_dimension_numbers<[1], [0], [0], [1], [0, 0, 1, 1], [], []>} : vector<16x4xbf16>, vector<4x32xbf16>, vector<16x32xf32> -> vector<16x32xf32>
    %171 = arith.addf %143, %170 : vector<16x32xf32>
    %172 = vector.extract_strided_slice %2 {offsets = [0, 24], sizes = [16, 4], strides = [1, 1]} : vector<16x96xf32> to vector<16x4xf32>
    %173 = vector.shape_cast %172 : vector<16x4xf32> to vector<2x8x4xf32>
    %174 = arith.truncf %173 : vector<2x8x4xf32> to vector<2x8x4xbf16>
    %175 = vector.extract_strided_slice %2 {offsets = [0, 56], sizes = [16, 4], strides = [1, 1]} : vector<16x96xf32> to vector<16x4xf32>
    %176 = vector.shape_cast %175 : vector<16x4xf32> to vector<2x8x4xf32>
    %177 = arith.truncf %176 : vector<2x8x4xf32> to vector<2x8x4xbf16>
    %178 = vector.extract_strided_slice %2 {offsets = [0, 88], sizes = [16, 4], strides = [1, 1]} : vector<16x96xf32> to vector<16x4xf32>
    %179 = vector.shape_cast %178 : vector<16x4xf32> to vector<2x8x4xf32>
    %180 = arith.truncf %179 : vector<2x8x4xf32> to vector<2x8x4xbf16>
    "tpu.trace_start"() <{level = 10 : i32, message = "bqd,bkd->bqk"}> : () -> ()
    %cst_47 = arith.constant dense<0.000000e+00> : vector<2x8x8xf32>
    %181 = tpu.matmul %174, %177, %cst_47 {dimension_numbers = #tpu.dot_dimension_numbers<[2], [2], [1], [1], [0, 0, 0, 1, 1, 1], [0], [0]>} : vector<2x8x4xbf16>, vector<2x8x4xbf16>, vector<2x8x8xf32> -> vector<2x8x8xf32>
    "tpu.trace_stop"() : () -> ()
    %cst_48 = arith.constant dense<0xFF800000> : vector<2x8xf32>
    %182 = vector.multi_reduction <maximumf>, %181, %cst_48 [2] : vector<2x8x8xf32> to vector<2x8xf32>
    %183 = vector.shape_cast %182 : vector<2x8xf32> to vector<2x8x1xf32>
    %184 = vector.broadcast %183 : vector<2x8x1xf32> to vector<2x8x8xf32>
    %185 = arith.subf %181, %184 : vector<2x8x8xf32>
    %186 = math.exp %185 : vector<2x8x8xf32>
    %cst_49 = arith.constant dense<0.000000e+00> : vector<2x8xf32>
    %187 = vector.multi_reduction <add>, %186, %cst_49 [2] : vector<2x8x8xf32> to vector<2x8xf32>
    %188 = vector.shape_cast %187 : vector<2x8xf32> to vector<2x8x1xf32>
    %189 = tpu.reciprocal %188 {approx = true} : vector<2x8x1xf32> -> vector<2x8x1xf32>
    %190 = vector.broadcast %189 : vector<2x8x1xf32> to vector<2x8x8xf32>
    %191 = arith.mulf %186, %190 : vector<2x8x8xf32>
    %192 = arith.truncf %191 : vector<2x8x8xf32> to vector<2x8x8xbf16>
    "tpu.trace_start"() <{level = 10 : i32, message = "bqk,bkd->bqd"}> : () -> ()
    %cst_50 = arith.constant dense<0.000000e+00> : vector<2x8x4xf32>
    %193 = tpu.matmul %192, %180, %cst_50 {dimension_numbers = #tpu.dot_dimension_numbers<[2], [1], [1], [2], [0, 0, 0, 1, 1, 2], [0], [0]>} : vector<2x8x8xbf16>, vector<2x8x4xbf16>, vector<2x8x4xf32> -> vector<2x8x4xf32>
    "tpu.trace_stop"() : () -> ()
    %194 = vector.shape_cast %193 : vector<2x8x4xf32> to vector<16x4xf32>
    %195 = arith.truncf %194 : vector<16x4xf32> to vector<16x4xbf16>
    %c6 = arith.constant 6 : index
    %c0_51 = arith.constant 0 : index
    %c0_52 = arith.constant 0 : index
    %196 = vector.load %arg3[%c6, %c0_51, %c0_52] : memref<8x4x32xbf16, #tpu.memory_space<vmem>>, vector<1x4x32xbf16>
    %197 = vector.shape_cast %196 : vector<1x4x32xbf16> to vector<4x32xbf16>
    %cst_53 = arith.constant dense<0.000000e+00> : vector<16x32xf32>
    %198 = tpu.matmul %195, %197, %cst_53 {dimension_numbers = #tpu.dot_dimension_numbers<[1], [0], [0], [1], [0, 0, 1, 1], [], []>} : vector<16x4xbf16>, vector<4x32xbf16>, vector<16x32xf32> -> vector<16x32xf32>
    %199 = arith.addf %171, %198 : vector<16x32xf32>
    %200 = vector.extract_strided_slice %2 {offsets = [0, 28], sizes = [16, 4], strides = [1, 1]} : vector<16x96xf32> to vector<16x4xf32>
    %201 = vector.shape_cast %200 : vector<16x4xf32> to vector<2x8x4xf32>
    %202 = arith.truncf %201 : vector<2x8x4xf32> to vector<2x8x4xbf16>
    %203 = vector.extract_strided_slice %2 {offsets = [0, 60], sizes = [16, 4], strides = [1, 1]} : vector<16x96xf32> to vector<16x4xf32>
    %204 = vector.shape_cast %203 : vector<16x4xf32> to vector<2x8x4xf32>
    %205 = arith.truncf %204 : vector<2x8x4xf32> to vector<2x8x4xbf16>
    %206 = vector.extract_strided_slice %2 {offsets = [0, 92], sizes = [16, 4], strides = [1, 1]} : vector<16x96xf32> to vector<16x4xf32>
    %207 = vector.shape_cast %206 : vector<16x4xf32> to vector<2x8x4xf32>
    %208 = arith.truncf %207 : vector<2x8x4xf32> to vector<2x8x4xbf16>
    "tpu.trace_start"() <{level = 10 : i32, message = "bqd,bkd->bqk"}> : () -> ()
    %cst_54 = arith.constant dense<0.000000e+00> : vector<2x8x8xf32>
    %209 = tpu.matmul %202, %205, %cst_54 {dimension_numbers = #tpu.dot_dimension_numbers<[2], [2], [1], [1], [0, 0, 0, 1, 1, 1], [0], [0]>} : vector<2x8x4xbf16>, vector<2x8x4xbf16>, vector<2x8x8xf32> -> vector<2x8x8xf32>
    "tpu.trace_stop"() : () -> ()
    %cst_55 = arith.constant dense<0xFF800000> : vector<2x8xf32>
    %210 = vector.multi_reduction <maximumf>, %209, %cst_55 [2] : vector<2x8x8xf32> to vector<2x8xf32>
    %211 = vector.shape_cast %210 : vector<2x8xf32> to vector<2x8x1xf32>
    %212 = vector.broadcast %211 : vector<2x8x1xf32> to vector<2x8x8xf32>
    %213 = arith.subf %209, %212 : vector<2x8x8xf32>
    %214 = math.exp %213 : vector<2x8x8xf32>
    %cst_56 = arith.constant dense<0.000000e+00> : vector<2x8xf32>
    %215 = vector.multi_reduction <add>, %214, %cst_56 [2] : vector<2x8x8xf32> to vector<2x8xf32>
    %216 = vector.shape_cast %215 : vector<2x8xf32> to vector<2x8x1xf32>
    %217 = tpu.reciprocal %216 {approx = true} : vector<2x8x1xf32> -> vector<2x8x1xf32>
    %218 = vector.broadcast %217 : vector<2x8x1xf32> to vector<2x8x8xf32>
    %219 = arith.mulf %214, %218 : vector<2x8x8xf32>
    %220 = arith.truncf %219 : vector<2x8x8xf32> to vector<2x8x8xbf16>
    "tpu.trace_start"() <{level = 10 : i32, message = "bqk,bkd->bqd"}> : () -> ()
    %cst_57 = arith.constant dense<0.000000e+00> : vector<2x8x4xf32>
    %221 = tpu.matmul %220, %208, %cst_57 {dimension_numbers = #tpu.dot_dimension_numbers<[2], [1], [1], [2], [0, 0, 0, 1, 1, 2], [0], [0]>} : vector<2x8x8xbf16>, vector<2x8x4xbf16>, vector<2x8x4xf32> -> vector<2x8x4xf32>
    "tpu.trace_stop"() : () -> ()
    %222 = vector.shape_cast %221 : vector<2x8x4xf32> to vector<16x4xf32>
    %223 = arith.truncf %222 : vector<16x4xf32> to vector<16x4xbf16>
    %c7 = arith.constant 7 : index
    %c0_58 = arith.constant 0 : index
    %c0_59 = arith.constant 0 : index
    %224 = vector.load %arg3[%c7, %c0_58, %c0_59] : memref<8x4x32xbf16, #tpu.memory_space<vmem>>, vector<1x4x32xbf16>
    %225 = vector.shape_cast %224 : vector<1x4x32xbf16> to vector<4x32xbf16>
    %cst_60 = arith.constant dense<0.000000e+00> : vector<16x32xf32>
    %226 = tpu.matmul %223, %225, %cst_60 {dimension_numbers = #tpu.dot_dimension_numbers<[1], [0], [0], [1], [0, 0, 1, 1], [], []>} : vector<16x4xbf16>, vector<4x32xbf16>, vector<16x32xf32> -> vector<16x32xf32>
    %227 = arith.addf %199, %226 : vector<16x32xf32>
    %c0_61 = arith.constant 0 : index
    %c0_62 = arith.constant 0 : index
    %228 = vector.load %arg4[%c0_61, %c0_62] : memref<1x32xf32, #tpu.memory_space<vmem>>, vector<1x32xf32>
    %229 = vector.broadcast %228 : vector<1x32xf32> to vector<16x32xf32>
    %230 = arith.addf %227, %229 : vector<16x32xf32>
    %c0_63 = arith.constant 0 : index
    %c0_64 = arith.constant 0 : index
    %231 = vector.load %arg5[%c0_63, %c0_64] : memref<16x32xf32, #tpu.memory_space<vmem>>, vector<16x32xf32>
    tpu.vector_store %arg5[%c0_63, %c0_64], %230 {strides = array<i32>} : memref<16x32xf32, #tpu.memory_space<vmem>>, vector<16x32xf32>,
    return
  }
  func.func @transform_0(%arg0: i32) -> (i32, i32) {
    %c0_i32 = arith.constant 0 : i32
    %c0_i32_0 = arith.constant 0 : i32
    %c0_i32_1 = arith.constant 0 : i32
    return %c0_i32, %c0_i32_0 : i32, i32
  }
  func.func @transform_1(%arg0: i32) -> (i32, i32) {
    %c0_i32 = arith.constant 0 : i32
    %c0_i32_0 = arith.constant 0 : i32
    %c0_i32_1 = arith.constant 0 : i32
    return %c0_i32, %c0_i32_0 : i32, i32
  }
  func.func @transform_2(%arg0: i32) -> (i32, i32, i32) {
    %c0_i32 = arith.constant 0 : i32
    %c0_i32_0 = arith.constant 0 : i32
    %c0_i32_1 = arith.constant 0 : i32
    %c0_i32_2 = arith.constant 0 : i32
    return %c0_i32, %c0_i32_0, %c0_i32_1 : i32, i32, i32
  }
  func.func @transform_3(%arg0: i32) -> (i32, i32) {
    %c0_i32 = arith.constant 0 : i32
    %c0_i32_0 = arith.constant 0 : i32
    %c0_i32_1 = arith.constant 0 : i32
    return %c0_i32, %c0_i32_0 : i32, i32
  }
  func.func @transform_4(%arg0: i32) -> (i32, i32) {
    %c0_i32 = arith.constant 0 : i32
    %c0_i32_0 = arith.constant 0 : i32
    %c0_i32_1 = arith.constant 0 : i32
    return %c0_i32, %c0_i32_0 : i32, i32
  }
}

</mosaic_0001>

<bundles_post_ra>
// kernel: tpu_custom_call.1
= control target key start
LH: loop header
LB: loop body
LE: loop exit
PB: predicated region body
PF: predicated region fallthrough
CT: control target
= control target key end

     0   :  { %9 = vsyncpa [#allocation3], 0  ;;  %s3360_s0 = inlined_call_operand.hbm [shape: bf16[16,32], index: 0, kind: input, shape index: {}]   ;;  %s3361_s1 = inlined_call_operand.hbm [shape: bf16[32,96], index: 1, kind: input, shape index: {}]   ;;  %s3362_s2 = inlined_call_operand.hbm [shape: bf16[8,4,32], index: 2, kind: input, shape index: {}]   ;;  %s3363_s3 = inlined_call_operand.vmem [shape: f32[1,32], index: 3, kind: input, shape index: {}]   ;;  %s3364_s4 = inlined_call_operand.hbm [shape: f32[16,32], index: 4, kind: output, shape index: {}]  }
   0x1   :  { %10 = vsyncpa [#allocation6], 0 }
   0x2   :  { %11 = vsyncpa [#allocation4], 0  ;;  %s2903_s15 = smov [#allocation5]   ;;  %s2904_s17 = smov [#allocation2]  }
   0x3   :  { %s29_s16 = sshll.u32 %s2903_s15, 4  ;;  %s17_s18 = sshll.u32 %s2904_s17, 4  ;;  %s30_s16 = int_to_ptr.vmem [resolvable:$true] %s29_s16  ;;  %s2962_s18 = int_to_ptr.vmem [resolvable:$true] %s17_s18 }
   0x4   :  { %s2809_s21 = scalar_lea.hbm %s3361_s1, 256 }
   0x5   :  { %p2810_p0 = scmp.ne.s32.totalorder %s3361_s1, %s2809_s21  ;;  %p2813_p1 = scmp.lt.u32.totalorder %s2809_s21, %s3361_s1 }
   0x7   :  { %p2815_p2 = pnand %p2813_p1, %p2810_p0 }
   0x9   :  { %2818 = shalt.err (!%p2815_p2)
}
   0xa   :  { %s2819_s26 = scalar_lea.vmem %s30_s16, 256  ;;  %p2824_p4 = scmp.lt.s32.totalorder %s30_s16, %s30_s16 }
   0xb   :  { %p2820_p3 = scmp.ne.s32.totalorder %s30_s16, %s2819_s26  ;;  %p2825_p5 = scmp.lt.s32.totalorder %s2819_s26, %s2819_s26 }
   0xd   :  { %p2826_p6 = por %p2825_p5, %p2824_p4 }
   0xf   :  { %p2827_p7 = pnand %p2826_p6, %p2820_p3 }
  0x11   :  { %2830 = shalt.err (!%p2827_p7)
}
  0x12   :  { %s2905_s27 = smov 64   ;;  %s2906_s28 = smov 4  }
  0x13   :  { %35 = dma.hbm_to_vmem [thread:$0]  %s3361_s1, 256, %s30_s16, [#allocation6], %s2905_s27, %s2905_s27, %s2906_s28  }
  0x14   :  { %s2831_s7 = scalar_lea.hbm %s3360_s0, 128 }
  0x15   :  { %p2832_p8 = scmp.ne.s32.totalorder %s3360_s0, %s2831_s7  ;;  %p2835_p9 = scmp.lt.u32.totalorder %s2831_s7, %s3360_s0 }
  0x17   :  { %p2837_p10 = pnand %p2835_p9, %p2832_p8 }
  0x19   :  { %2840 = shalt.err (!%p2837_p10)
}
  0x1a   :  { %s2841_s12 = scalar_lea.vmem %s2962_s18, 128  ;;  %p2846_p12 = scmp.lt.s32.totalorder %s2962_s18, %s2962_s18 }
  0x1b   :  { %p2842_p11 = scmp.ne.s32.totalorder %s2962_s18, %s2841_s12  ;;  %p2847_p13 = scmp.lt.s32.totalorder %s2841_s12, %s2841_s12 }
  0x1d   :  { %p2848_p0 = por %p2847_p13, %p2846_p12 }
  0x1f   :  { %p2849_p1 = pnand %p2848_p0, %p2842_p11 }
  0x21   :  { %2852 = shalt.err (!%p2849_p1)
}
  0x22   :  { %23 = dma.hbm_to_vmem [thread:$0]  %s3360_s0, 128, %s2962_s18, [#allocation3], %s2905_s27, %s2905_s27, %s2906_s28  }
  0x23   :  { %s2907_s14 = smov [#allocation7]   ;;  %s2853_s19 = scalar_lea.hbm %s3362_s2, 256 }
  0x24   :  { %s41_s15 = sshll.u32 %s2907_s14, 4  ;;  %p2854_p2 = scmp.ne.s32.totalorder %s3362_s2, %s2853_s19  ;;  %s42_s15 = int_to_ptr.vmem [resolvable:$true] %s41_s15 }
  0x25   :  { %p2857_p3 = scmp.lt.u32.totalorder %s2853_s19, %s3362_s2 }
  0x27   :  { %p2859_p4 = pnand %p2857_p3, %p2854_p2 }
  0x29   :  { %2862 = shalt.err (!%p2859_p4)
}
  0x2a   :  { %s2863_s24 = scalar_lea.vmem %s42_s15, 256  ;;  %p2868_p6 = scmp.lt.s32.totalorder %s42_s15, %s42_s15 }
  0x2b   :  { %p2864_p5 = scmp.ne.s32.totalorder %s42_s15, %s2863_s24  ;;  %p2869_p7 = scmp.lt.s32.totalorder %s2863_s24, %s2863_s24 }
  0x2d   :  { %p2870_p8 = por %p2869_p7, %p2868_p6 }
  0x2f   :  { %p2871_p9 = pnand %p2870_p8, %p2864_p5 }
  0x31   :  { %2874 = shalt.err (!%p2871_p9)
}
  0x32   :  { %s2908_s0 = smov 32   ;;  %s2909_s18 = smov 2  }
  0x33   :  { %47 = dma.hbm_to_vmem [thread:$0]  %s3362_s2, 256, %s42_s15, [#allocation6], %s2908_s0, %s2908_s0, %s2909_s18  }
  0x34   :  { %2897 = dma.done.wait [#allocation3], 128  }
  0x35   :  { %2898 = vsyncadd [#allocation3], 4294967168 }
  0x36   :  { %2899 = dma.done.wait [#allocation6], 512  }
  0x37   :  { %2900 = vsyncadd [#allocation6], 4294966784  ;;  %v2910_v0 = vmov 0.0   ;;  %vm2911_vm0 = vmmov 0   ;;  %v2742_v1 = vld [vmem:[#allocation5] sm:$0xff]   ;;  %v2743_v2 = vld [vmem:[#allocation5 + $0x8] sm:$0xff]  }
  0x38   :  { %2460 = vmatprep.subr.bf16.mxu0 %v2910_v0  ;;  %2464 = vmatprep.mubr.msk.bf16.mxu0 %vm2911_vm0, %v2910_v0  ;;  %v2744_v3 = vld [vmem:[#allocation2] sm:$0xff]   ;;  %vm83_vm1 = vcmask 261120   ;;  %s2912_s2 = smov 96   ;;  %vm133_vm2 = vcmask 31744   ;;  %vm229_vm3 = vcmask 64512   ;;  %s2913_s28 = smov 92  }
  0x39   :  { %2468 = vmatprep.subr.bf16.mxu1 %v2910_v0  ;;  %2470 = vmatprep.mubr.msk.bf16.mxu1 %vm2911_vm0, %v2910_v0  ;;  %vm259_vm4 = vcmask 1043456   ;;  %s2915_s29 = smov 60   ;;  %s2916_s30 = smov 120   ;;  %vm579_vm5 = vcmask 1041408  }
  0x3a   :  { %2461 = vmatpush3.bf16.msra.mxu0 %v2742_v1  ;;  %s2917_s5 = smov 88   ;;  %s2918_s6 = smov 56  }
  0x3b   :  { %2462 = vmatprep.subr.bf16.mxu0 %v2910_v0  ;;  %s2919_s7 = smov 84   ;;  %s2920_s8 = smov 116  }
  0x3c   :  { %s2921_s9 = smov 52   ;;  %s2922_s10 = smov 80  }
  0x3d   :  { %s2923_s11 = smov 112   ;;  %s2924_s12 = smov 48  }
  0x3e   :  { %2463 = vmatpush3.bf16.msra.mxu0 %v2743_v2  ;;  %s2925_s1 = smov 76   ;;  %s2926_s13 = smov 108  }
  0x3f   :  { %2474 = vmatprep.subr.bf16.mxu0 %v2910_v0  ;;  %s2927_s14 = smov 44   ;;  %s2928_s15 = smov 72  }
  0x40   :  { %s2929_s16 = smov 104   ;;  %s2930_s17 = smov 40  }
  0x41   :  { %2465 = vmatmul.mubr.msk.bf16.vlgmr.msra.gmra.mrb[0].mxu0 %vm83_vm1, %v2744_v3  ;;  %s2931_s19 = smov 68   ;;  %s2932_s20 = smov 100  }
  0x42   :  { %2476 = vmatprep.mubr.msk.bf16.mxu0 %vm2911_vm0, %v2910_v0  ;;  %s2933_s21 = smov 36   ;;  %s2934_s24 = smov [#allocation8]  }
  0x43   :  { %s2319_s0 = sshll.u32 %s2934_s24, 4  ;;  %s2320_s0 = int_to_ptr.vmem [resolvable:$true] %s2319_s0 }
  0x44   :  { %s2875_s18 = scalar_lea.vmem %s2320_s0, 256  ;;  %p2880_p11 = scmp.lt.s32.totalorder %s2320_s0, %s2320_s0 }
  0x45   :  { %p2876_p10 = scmp.ne.s32.totalorder %s2320_s0, %s2875_s18  ;;  %p2881_p12 = scmp.lt.s32.totalorder %s2875_s18, %s2875_s18 }
  0x47   :  { %p2882_p13 = por %p2881_p12, %p2880_p11 }
  0x49   :  { %p2883_p0 = pnand %p2882_p13, %p2876_p10 }
 0x114   :  { %v121_v4 = vpop.f32.mrb[0].mxu0 }
 0x115   :  { %v3020_v5 = vpack.c.bf16 %v121_v4, %v121_v4  ;;  %v2466_v6 = vpop.f32.mrb[1].mxu0 }
 0x116   :  { %v124_v7 = vpop.f32.mrb[2].mxu0 }
 0x117   :  { %131 = vrot.lane.b32.xlu0 %v3020_v5, %s2912_s2  ;;  %v2467_v8 = vpop.f32.mrb[3].mxu0  ;;  %v3023_v9 = vpack.c.bf16 %v124_v7, %v124_v7 }
 0x11b   :  { %181 = vrot.lane.b32.xlu0 %v3023_v9, %s2912_s2 }
 0x189   :  { %v132_v10 = vpop.permute.xlu0 %131 }
 0x18a   :  { %v138_v11 = vsel %vm133_vm2, %v132_v10, 0 }
 0x18b   :  { %2469 = vmatpush3.bf16.xpose.msra.mxu1 %v138_v11 }
 0x18c   :  { %2480 = vmatprep.subr.bf16.mxu1 %v2910_v0 }
 0x18d   :  { %v182_v12 = vpop.permute.xlu0 %181 }
 0x18e   :  { %v187_v13 = vsel %vm133_vm2, %v182_v12, 0 }
 0x18f   :  { %2475 = vmatpush3.bf16.xpose.msra.mxu0 %v187_v13 }
 0x190   :  { %2486 = vmatprep.subr.bf16.mxu0 %v2910_v0 }
 0x192   :  { %2471 = vmatmul.mubr.msk.bf16.vlgmr.msra.gmra.mrb[0].mxu1 %vm133_vm2, %v3020_v5 }
 0x193   :  { %2482 = vmatprep.mubr.msk.bf16.mxu1 %vm2911_vm0, %v2910_v0 }
 0x196   :  { %2477 = vmatmul.mubr.msk.bf16.vlgmr.msra.gmra.mrb[4].mxu0 %vm133_vm2, %v3023_v9 }
 0x197   :  { %2488 = vmatprep.mubr.msk.bf16.mxu0 %vm2911_vm0, %v2910_v0 }
 0x265   :  { %v174_v14 = vpop.f32.mrb[0].mxu1 }
 0x266   :  { %v2472_v15 = vpop.f32.mrb[1].mxu1  ;;  %v230_v16 = vsel %vm229_vm3, %v174_v14, -inf }
 0x267   :  { %231 = vmax.xlane.f32.xlu1 %v230_v16  ;;  %v177_v17 = vpop.f32.mrb[2].mxu1 }
 0x268   :  { %v2473_v18 = vpop.f32.mrb[3].mxu1 }
 0x269   :  { %v223_v19 = vpop.f32.mrb[4].mxu0 }
 0x26a   :  { %v2478_v20 = vpop.f32.mrb[5].mxu0  ;;  %v233_v21 = vsel %vm229_vm3, %v223_v19, -inf }
 0x26b   :  { %234 = vmax.xlane.f32.xlu1 %v233_v21  ;;  %v226_v22 = vpop.f32.mrb[6].mxu0 }
 0x26c   :  { %v2479_v23 = vpop.f32.mrb[7].mxu0 }
 0x27c   :  { %254 = vrot.lane.b32.xlu1 %v3020_v5, %s2905_s27 }
 0x280   :  { %303 = vrot.lane.b32.xlu1 %v3023_v9, %s2905_s27  ;;  %s2914_s27 = smov 124  }
 0x284   :  { %355 = vrot.lane.b32.xlu1 %v3020_v5, %s2913_s28 }
 0x2f4   :  { %v232_v24 = vpop.xlane.xlu1 %231 }
 0x2f5   :  { %v236_v25 = vsub.f32 %v174_v14, %v232_v24 }
 0x2f7   :  { %v238_v26 = vmul.f32 1.442695, %v236_v25 }
 0x2f8   :  { %v235_v27 = vpop.xlane.xlu1 %234 }
 0x2f9   :  { %2745 = vpow2.f32 %v238_v26  ;;  %v237_v28 = vsub.f32 %v223_v19, %v235_v27  ;;  %v575_v27 = vld [vmem:[#allocation7 + $0x2] sm:$0x3] }
 0x2fb   :  { %v240_v29 = vmul.f32 1.442695, %v237_v28 }
 0x2fc   :  { %v255_v30 = vpop.permute.xlu1 %254 }
 0x2fd   :  { %2747 = vpow2.f32 %v240_v29  ;;  %v261_v31 = vsel %vm259_vm4, %v255_v30, 0  ;;  %v581_v30 = vsel %vm579_vm5, %v575_v27, 0 }
 0x2fe   :  { %2481 = vmatpush3.bf16.msra.mxu1 %v261_v31 }
 0x2ff   :  { %2492 = vmatprep.subr.bf16.mxu1 %v2910_v0 }
 0x300   :  { %v304_v32 = vpop.permute.xlu1 %303 }
 0x301   :  { %v309_v33 = vsel %vm259_vm4, %v304_v32, 0  ;;  %v352_v32 = vld [vmem:[#allocation7] sm:$0x3] }
 0x302   :  { %2487 = vmatpush3.bf16.msra.mxu0 %v309_v33 }
 0x303   :  { %v2746_v34 = vpop.eup %2745  ;;  %2498 = vmatprep.subr.bf16.mxu0 %v2910_v0 }
 0x304   :  { %v242_v35 = vsel %vm229_vm3, %v2746_v34, 0.0  ;;  %v356_v38 = vpop.permute.xlu1 %355 }
 0x305   :  { %243 = vadd.xlane.f32.xlu0 %v242_v35  ;;  %v361_v45 = vsel %vm133_vm2, %v356_v38, 0  ;;  %v628_v35 = vsel %vm579_vm5, %v352_v32, 0 }
 0x307   :  { %v2748_v36 = vpop.eup %2747 }
 0x308   :  { %v245_v37 = vsel %vm229_vm3, %v2748_v36, 0.0 }
 0x309   :  { %246 = vadd.xlane.f32.xlu1 %v245_v37 }
 0x31a   :  { %405 = vrot.lane.b32.xlu1 %v3023_v9, %s2913_s28 }
 0x31b   :  { %353 = vrot.lane.b32.xlu0 %v3020_v5, %s2914_s27 }
 0x31e   :  { %403 = vrot.lane.b32.xlu1 %v3023_v9, %s2914_s27 }
 0x392   :  { %v244_v39 = vpop.xlane.xlu0 %243 }
 0x393   :  { %2749 = vrcp.f32 %v244_v39 }
 0x396   :  { %v247_v40 = vpop.xlane.xlu1 %246  ;;  %v354_v50 = vpop.permute.xlu0 %353 }
 0x397   :  { %2751 = vrcp.f32 %v247_v40 }
 0x39a   :  { %v406_v47 = vpop.permute.xlu1 %405 }
 0x39b   :  { %v411_v49 = vsel %vm133_vm2, %v406_v47, 0 }
 0x39d   :  { %v2750_v41 = vpop.eup %2749 }
 0x39e   :  { %v250_v42 = vmul.f32 %v2750_v41, %v2746_v34  ;;  %v404_v51 = vpop.permute.xlu1 %403 }
 0x3a0   :  { %v252_v43 = vpack.c.bf16 %v250_v42, %v250_v42 }
 0x3a1   :  { %v2752_v44 = vpop.eup %2751 }
 0x3a2   :  { %v251_v46 = vmul.f32 %v2752_v44, %v2748_v36  ;;  %2483 = vmatmul.mubr.msk.bf16.vlgmr.msra.gmra.mrb[4].mxu1 %vm229_vm3, %v252_v43 }
 0x3a3   :  { %2493 = vmatpush3.bf16.xpose.msra.mxu1 %v361_v45  ;;  %2494 = vmatprep.mubr.msk.bf16.mxu1 %vm2911_vm0, %v2910_v0 }
 0x3a4   :  { %v253_v48 = vpack.c.bf16 %v251_v46, %v251_v46  ;;  %2504 = vmatprep.subr.bf16.mxu1 %v2910_v0 }
 0x3a6   :  { %2489 = vmatmul.mubr.msk.bf16.vlgmr.msra.gmra.mrb[8].mxu0 %vm229_vm3, %v253_v48 }
 0x3a7   :  { %2499 = vmatpush3.bf16.xpose.msra.mxu0 %v411_v49  ;;  %2500 = vmatprep.mubr.msk.bf16.mxu0 %vm2911_vm0, %v2910_v0 }
 0x3a8   :  { %2510 = vmatprep.subr.bf16.mxu0 %v2910_v0 }
 0x3aa   :  { %2495 = vmatmul.mubr.msk.bf16.vlgmr.msra.gmra.mrb[8].mxu1 %vm133_vm2, %v354_v50 }
 0x3ab   :  { %2506 = vmatprep.mubr.msk.bf16.mxu1 %vm2911_vm0, %v2910_v0 }
 0x3ae   :  { %2501 = vmatmul.mubr.msk.bf16.vlgmr.msra.gmra.mrb[12].mxu0 %vm133_vm2, %v404_v51 }
 0x3af   :  { %2512 = vmatprep.mubr.msk.bf16.mxu0 %vm2911_vm0, %v2910_v0 }
 0x475   :  { %v3070_v52 = vpop.f32.mrb[4].mxu1 }
 0x476   :  { %v2484_v53 = vpop.f32.mrb[5].mxu1 }
 0x477   :  { %v300_v54 = vpop.f32.mrb[6].mxu1 }
 0x478   :  { %v2485_v55 = vpop.f32.mrb[7].mxu1 }
 0x479   :  { %v3072_v56 = vpop.f32.mrb[8].mxu0 }
 0x47a   :  { %v351_v57 = vpack.c.bf16 %v3072_v56, %v3070_v52  ;;  %v2490_v58 = vpop.f32.mrb[9].mxu0 }
 0x47b   :  { %v348_v59 = vpop.f32.mrb[10].mxu0 }
 0x47c   :  { %v2491_v60 = vpop.f32.mrb[11].mxu0 }
 0x47d   :  { %v397_v61 = vpop.f32.mrb[8].mxu1 }
 0x47e   :  { %v2496_v62 = vpop.f32.mrb[9].mxu1  ;;  %v453_v63 = vsel %vm229_vm3, %v397_v61, -inf }
 0x47f   :  { %454 = vmax.xlane.f32.xlu1 %v453_v63  ;;  %v400_v1 = vpop.f32.mrb[10].mxu1 }
 0x480   :  { %v2497_v2 = vpop.f32.mrb[11].mxu1 }
 0x481   :  { %v447_v3 = vpop.f32.mrb[12].mxu0 }
 0x482   :  { %v2502_v4 = vpop.f32.mrb[13].mxu0  ;;  %v456_v6 = vsel %vm229_vm3, %v447_v3, -inf }
 0x483   :  { %457 = vmax.xlane.f32.xlu0 %v456_v6  ;;  %v450_v7 = vpop.f32.mrb[14].mxu0 }
 0x484   :  { %v2503_v8 = vpop.f32.mrb[15].mxu0 }
 0x499   :  { %525 = vrot.lane.b32.xlu0 %v3023_v9, %s2915_s29 }
 0x49d   :  { %671 = vrot.lane.b32.xlu0 %v3020_v5, %s2916_s30 }
 0x50c   :  { %v455_v10 = vpop.xlane.xlu1 %454 }
 0x50d   :  { %v459_v11 = vsub.f32 %v397_v61, %v455_v10 }
 0x50f   :  { %v461_v12 = vmul.f32 1.442695, %v459_v11 }
 0x510   :  { %v458_v13 = vpop.xlane.xlu0 %457 }
 0x511   :  { %2753 = vpow2.f32 %v461_v12  ;;  %v460_v14 = vsub.f32 %v447_v3, %v458_v13 }
 0x513   :  { %v463_v15 = vmul.f32 1.442695, %v460_v14 }
 0x514   :  { %v526_v16 = vpop.permute.xlu0 %525 }
 0x515   :  { %2755 = vpow2.f32 %v463_v15  ;;  %v531_v17 = vsel %vm259_vm4, %v526_v16, 0 }
 0x516   :  { %2511 = vmatpush3.bf16.msra.mxu0 %v531_v17 }
 0x517   :  { %2522 = vmatprep.subr.bf16.mxu0 %v2910_v0 }
 0x518   :  { %v672_v52 = vpop.permute.xlu0 %671 }
 0x51b   :  { %v2754_v18 = vpop.eup %2753 }
 0x51c   :  { %v465_v19 = vsel %vm229_vm3, %v2754_v18, 0.0 }
 0x51d   :  { %466 = vadd.xlane.f32.xlu1 %v465_v19 }
 0x51f   :  { %v2756_v20 = vpop.eup %2755 }
 0x520   :  { %v468_v21 = vsel %vm229_vm3, %v2756_v20, 0.0 }
 0x521   :  { %469 = vadd.xlane.f32.xlu1 %v468_v21 }
 0x532   :  { %477 = vrot.lane.b32.xlu1 %v3020_v5, %s2915_s29 }
 0x536   :  { %673 = vrot.lane.b32.xlu1 %v3020_v5, %s2917_s5 }
 0x53a   :  { %723 = vrot.lane.b32.xlu1 %v3023_v9, %s2917_s5 }
 0x53e   :  { %721 = vrot.lane.b32.xlu1 %v3023_v9, %s2916_s30 }
 0x5aa   :  { %v467_v22 = vpop.xlane.xlu1 %466 }
 0x5ab   :  { %2757 = vrcp.f32 %v467_v22 }
 0x5ae   :  { %v470_v23 = vpop.xlane.xlu1 %469 }
 0x5af   :  { %2759 = vrcp.f32 %v470_v23 }
 0x5b2   :  { %v478_v24 = vpop.permute.xlu1 %477 }
 0x5b3   :  { %v483_v25 = vsel %vm259_vm4, %v478_v24, 0 }
 0x5b4   :  { %2505 = vmatpush3.bf16.msra.mxu1 %v483_v25 }
 0x5b5   :  { %v2758_v26 = vpop.eup %2757  ;;  %2516 = vmatprep.subr.bf16.mxu1 %v2910_v0 }
 0x5b6   :  { %v473_v28 = vmul.f32 %v2758_v26, %v2754_v18  ;;  %v674_v36 = vpop.permute.xlu1 %673 }
 0x5b7   :  { %v679_v48 = vsel %vm133_vm2, %v674_v36, 0 }
 0x5b8   :  { %v475_v29 = vpack.c.bf16 %v473_v28, %v473_v28 }
 0x5b9   :  { %v2760_v31 = vpop.eup %2759 }
 0x5ba   :  { %v474_v33 = vmul.f32 %v2760_v31, %v2756_v20  ;;  %2507 = vmatmul.mubr.msk.bf16.vlgmr.msra.gmra.mrb[12].mxu1 %vm229_vm3, %v475_v29  ;;  %v724_v37 = vpop.permute.xlu1 %723 }
 0x5bb   :  { %2517 = vmatpush3.bf16.msra.mxu1 %v581_v30  ;;  %2518 = vmatprep.mubr.msk.bf16.mxu1 %vm2911_vm0, %v2910_v0  ;;  %v729_v38 = vsel %vm133_vm2, %v724_v37, 0 }
 0x5bc   :  { %v476_v34 = vpack.c.bf16 %v474_v33, %v474_v33  ;;  %2528 = vmatprep.subr.bf16.mxu1 %v2910_v0 }
 0x5be   :  { %2513 = vmatmul.mubr.msk.bf16.vlgmr.msra.gmra.mrb[16].mxu0 %vm229_vm3, %v476_v34  ;;  %v722_v39 = vpop.permute.xlu1 %721 }
 0x5bf   :  { %2523 = vmatpush3.bf16.msra.mxu0 %v628_v35  ;;  %2524 = vmatprep.mubr.msk.bf16.mxu0 %vm2911_vm0, %v2910_v0  ;;  %v893_v35 = vld [vmem:[#allocation7 + $0x4] sm:$0x3] }
 0x5c0   :  { %2534 = vmatprep.subr.bf16.mxu0 %v2910_v0  ;;  %v898_v36 = vsel %vm579_vm5, %v893_v35, 0 }
 0x5c6   :  { %2525 = vmatmul.mubr.msk.bf16.vlgmr.msra.gmra.mrb[20].mxu0 %vm133_vm2, %v351_v57 }
 0x5c7   :  { %2536 = vmatprep.mubr.msk.bf16.mxu0 %vm2911_vm0, %v2910_v0 }
 0x5c8   :  { %2535 = vmatpush3.bf16.xpose.msra.mxu0 %v729_v38 }
 0x5c9   :  { %2546 = vmatprep.subr.bf16.mxu0 %v2910_v0 }
 0x5cf   :  { %2537 = vmatmul.mubr.msk.bf16.vlgmr.msra.gmra.mrb[24].mxu0 %vm133_vm2, %v722_v39 }
 0x5d0   :  { %2548 = vmatprep.mubr.msk.bf16.mxu0 %vm2911_vm0, %v2910_v0 }
 0x68d   :  { %v519_v40 = vpop.f32.mrb[12].mxu1 }
 0x68e   :  { %v2508_v41 = vpop.f32.mrb[13].mxu1 }
 0x68f   :  { %v522_v42 = vpop.f32.mrb[14].mxu1 }
 0x690   :  { %v2509_v43 = vpop.f32.mrb[15].mxu1 }
 0x691   :  { %v567_v44 = vpop.f32.mrb[16].mxu0 }
 0x692   :  { %v573_v45 = vpack.c.bf16 %v567_v44, %v519_v40  ;;  %v2514_v46 = vpop.f32.mrb[17].mxu0 }
 0x693   :  { %v570_v47 = vpop.f32.mrb[18].mxu0 }
 0x694   :  { %v2515_v49 = vpop.f32.mrb[19].mxu0  ;;  %2519 = vmatmul.mubr.msk.bf16.vlgmr.msra.gmra.mrb[16].mxu1 %vm133_vm2, %v573_v45 }
 0x695   :  { %2529 = vmatpush3.bf16.xpose.msra.mxu1 %v679_v48  ;;  %2530 = vmatprep.mubr.msk.bf16.mxu1 %vm2911_vm0, %v2910_v0 }
 0x696   :  { %2540 = vmatprep.subr.bf16.mxu1 %v2910_v0 }
 0x699   :  { %v664_v50 = vpop.f32.mrb[20].mxu0 }
 0x69a   :  { %v2526_v51 = vpop.f32.mrb[21].mxu0 }
 0x69b   :  { %v667_v53 = vpop.f32.mrb[22].mxu0 }
 0x69c   :  { %v2527_v54 = vpop.f32.mrb[23].mxu0  ;;  %2531 = vmatmul.mubr.msk.bf16.vlgmr.msra.gmra.mrb[20].mxu1 %vm133_vm2, %v672_v52 }
 0x69d   :  { %2542 = vmatprep.mubr.msk.bf16.mxu1 %vm2911_vm0, %v2910_v0 }
 0x6a2   :  { %v765_v55 = vpop.f32.mrb[24].mxu0 }
 0x6a3   :  { %v2538_v56 = vpop.f32.mrb[25].mxu0  ;;  %v774_v57 = vsel %vm229_vm3, %v765_v55, -inf }
 0x6a4   :  { %775 = vmax.xlane.f32.xlu1 %v774_v57  ;;  %v768_v58 = vpop.f32.mrb[26].mxu0 }
 0x6a5   :  { %v2539_v59 = vpop.f32.mrb[27].mxu0 }
 0x6b5   :  { %795 = vrot.lane.b32.xlu1 %v3020_v5, %s2918_s6 }
 0x6b9   :  { %945 = vrot.lane.b32.xlu1 %v3020_v5, %s2919_s7 }
 0x6bd   :  { %995 = vrot.lane.b32.xlu1 %v3023_v9, %s2919_s7 }
 0x6c1   :  { %993 = vrot.lane.b32.xlu1 %v3023_v9, %s2920_s8 }
 0x731   :  { %v776_v60 = vpop.xlane.xlu1 %775 }
 0x732   :  { %v778_v63 = vsub.f32 %v765_v55, %v776_v60 }
 0x734   :  { %v781_v1 = vmul.f32 1.442695, %v778_v63 }
 0x735   :  { %v796_v61 = vpop.permute.xlu1 %795 }
 0x736   :  { %v801_v62 = vsel %vm259_vm4, %v796_v61, 0  ;;  %2761 = vpow2.f32 %v781_v1 }
 0x737   :  { %2541 = vmatpush3.bf16.msra.mxu1 %v801_v62 }
 0x738   :  { %2552 = vmatprep.subr.bf16.mxu1 %v2910_v0 }
 0x739   :  { %v946_v30 = vpop.permute.xlu1 %945 }
 0x73a   :  { %v951_v32 = vsel %vm133_vm2, %v946_v30, 0 }
 0x73d   :  { %v996_v41 = vpop.permute.xlu1 %995 }
 0x73e   :  { %v1001_v46 = vsel %vm133_vm2, %v996_v41, 0 }
 0x740   :  { %v2762_v13 = vpop.eup %2761 }
 0x741   :  { %v786_v16 = vsel %vm229_vm3, %v2762_v13, 0.0 }
 0x767   :  { %v617_v2 = vpop.f32.mrb[16].mxu1 }
 0x768   :  { %v3128_v3 = vadd.f32 %v664_v50, %v617_v2  ;;  %v2520_v4 = vpop.f32.mrb[17].mxu1 }
 0x769   :  { %v620_v6 = vpop.f32.mrb[18].mxu1 }
 0x76a   :  { %v3130_v7 = vadd.f32 %v667_v53, %v620_v6  ;;  %v2521_v8 = vpop.f32.mrb[19].mxu1  ;;  %v994_v53 = vpop.permute.xlu1 %993 }
 0x76f   :  { %v715_v10 = vpop.f32.mrb[20].mxu1 }
 0x770   :  { %v2532_v11 = vpop.f32.mrb[21].mxu1  ;;  %v771_v12 = vsel %vm229_vm3, %v715_v10, -inf }
 0x771   :  { %772 = vmax.xlane.f32.xlu0 %v771_v12  ;;  %v718_v14 = vpop.f32.mrb[22].mxu1 }
 0x772   :  { %v2533_v15 = vpop.f32.mrb[23].mxu1 }
 0x775   :  { %787 = vadd.xlane.f32.xlu0 %v786_v16 }
 0x7fe   :  { %v773_v17 = vpop.xlane.xlu0 %772 }
 0x7ff   :  { %v777_v18 = vsub.f32 %v715_v10, %v773_v17 }
 0x801   :  { %v779_v19 = vmul.f32 1.442695, %v777_v18 }
 0x802   :  { %v788_v22 = vpop.xlane.xlu0 %787 }
 0x803   :  { %2763 = vpow2.f32 %v779_v19 }
 0x804   :  { %2765 = vrcp.f32 %v788_v22 }
 0x80d   :  { %v2764_v20 = vpop.eup %2763 }
 0x80e   :  { %v783_v21 = vsel %vm229_vm3, %v2764_v20, 0.0  ;;  %v2766_v23 = vpop.eup %2765 }
 0x80f   :  { %784 = vadd.xlane.f32.xlu0 %v783_v21  ;;  %v792_v25 = vmul.f32 %v2766_v23, %v2762_v13 }
 0x811   :  { %v794_v28 = vpack.c.bf16 %v792_v25, %v792_v25 }
 0x825   :  { %843 = vrot.lane.b32.xlu0 %v3023_v9, %s2918_s6 }
 0x829   :  { %943 = vrot.lane.b32.xlu0 %v3020_v5, %s2920_s8 }
 0x89c   :  { %v785_v24 = vpop.xlane.xlu0 %784 }
 0x89d   :  { %2767 = vrcp.f32 %v785_v24 }
 0x8a0   :  { %v844_v26 = vpop.permute.xlu0 %843 }
 0x8a1   :  { %v849_v27 = vsel %vm259_vm4, %v844_v26, 0 }
 0x8a2   :  { %2547 = vmatpush3.bf16.msra.mxu0 %v849_v27 }
 0x8a3   :  { %2558 = vmatprep.subr.bf16.mxu0 %v2910_v0 }
 0x8a4   :  { %v944_v34 = vpop.permute.xlu0 %943 }
 0x8a5   :  { %2549 = vmatmul.mubr.msk.bf16.vlgmr.msra.gmra.mrb[28].mxu0 %vm229_vm3, %v794_v28 }
 0x8a6   :  { %2560 = vmatprep.mubr.msk.bf16.mxu0 %vm2911_vm0, %v2910_v0 }
 0x8a7   :  { %v2768_v29 = vpop.eup %2767 }
 0x8a8   :  { %v791_v31 = vmul.f32 %v2768_v29, %v2764_v20  ;;  %v1165_v20 = vld [vmem:[#allocation7 + $0x6] sm:$0x3] }
 0x8a9   :  { %v1170_v21 = vsel %vm579_vm5, %v1165_v20, 0 }
 0x8aa   :  { %v793_v33 = vpack.c.bf16 %v791_v31, %v791_v31 }
 0x8ab   :  { %2559 = vmatpush3.bf16.xpose.msra.mxu0 %v951_v32 }
 0x8ac   :  { %2543 = vmatmul.mubr.msk.bf16.vlgmr.msra.gmra.mrb[24].mxu1 %vm229_vm3, %v793_v33  ;;  %2570 = vmatprep.subr.bf16.mxu0 %v2910_v0 }
 0x8ad   :  { %2554 = vmatprep.mubr.msk.bf16.mxu1 %vm2911_vm0, %v2910_v0  ;;  %2553 = vmatpush3.bf16.msra.mxu1 %v898_v36 }
 0x8ae   :  { %2564 = vmatprep.subr.bf16.mxu1 %v2910_v0 }
 0x8b2   :  { %2561 = vmatmul.mubr.msk.bf16.vlgmr.msra.gmra.mrb[32].mxu0 %vm133_vm2, %v944_v34 }
 0x8b3   :  { %2572 = vmatprep.mubr.msk.bf16.mxu0 %vm2911_vm0, %v2910_v0 }
 0x978   :  { %v885_v37 = vpop.f32.mrb[28].mxu0 }
 0x979   :  { %v2550_v38 = vpop.f32.mrb[29].mxu0 }
 0x97a   :  { %v888_v39 = vpop.f32.mrb[30].mxu0 }
 0x97b   :  { %v2551_v40 = vpop.f32.mrb[31].mxu0 }
 0x97f   :  { %v837_v42 = vpop.f32.mrb[24].mxu1 }
 0x980   :  { %v891_v43 = vpack.c.bf16 %v885_v37, %v837_v42  ;;  %v2544_v44 = vpop.f32.mrb[25].mxu1 }
 0x981   :  { %v840_v45 = vpop.f32.mrb[26].mxu1 }
 0x982   :  { %v2545_v47 = vpop.f32.mrb[27].mxu1  ;;  %2555 = vmatmul.mubr.msk.bf16.vlgmr.msra.gmra.mrb[28].mxu1 %vm133_vm2, %v891_v43 }
 0x983   :  { %2565 = vmatpush3.bf16.xpose.msra.mxu1 %v1001_v46  ;;  %2566 = vmatprep.mubr.msk.bf16.mxu1 %vm2911_vm0, %v2910_v0 }
 0x984   :  { %2576 = vmatprep.subr.bf16.mxu1 %v2910_v0 }
 0x985   :  { %v987_v48 = vpop.f32.mrb[32].mxu0 }
 0x986   :  { %v2562_v49 = vpop.f32.mrb[33].mxu0  ;;  %v1043_v50 = vsel %vm229_vm3, %v987_v48, -inf }
 0x987   :  { %1044 = vmax.xlane.f32.xlu0 %v1043_v50  ;;  %v990_v51 = vpop.f32.mrb[34].mxu0 }
 0x988   :  { %v2563_v52 = vpop.f32.mrb[35].mxu0 }
 0x98a   :  { %2567 = vmatmul.mubr.msk.bf16.vlgmr.msra.gmra.mrb[32].mxu1 %vm133_vm2, %v994_v53 }
 0x98b   :  { %2578 = vmatprep.mubr.msk.bf16.mxu1 %vm2911_vm0, %v2910_v0 }
 0xa14   :  { %v1045_v54 = vpop.xlane.xlu0 %1044 }
 0xa15   :  { %v1049_v55 = vsub.f32 %v987_v48, %v1045_v54 }
 0xa17   :  { %v1051_v56 = vmul.f32 1.442695, %v1049_v55 }
 0xa19   :  { %2769 = vpow2.f32 %v1051_v56 }
 0xa23   :  { %v2770_v57 = vpop.eup %2769 }
 0xa24   :  { %v1055_v58 = vsel %vm229_vm3, %v2770_v57, 0.0 }
 0xa25   :  { %1056 = vadd.xlane.f32.xlu0 %v1055_v58 }
 0xa55   :  { %v934_v59 = vpop.f32.mrb[28].mxu1 }
 0xa56   :  { %v3165_v60 = vadd.f32 %v934_v59, %v3128_v3  ;;  %v2556_v61 = vpop.f32.mrb[29].mxu1 }
 0xa57   :  { %v937_v62 = vpop.f32.mrb[30].mxu1 }
 0xa58   :  { %v3168_v63 = vadd.f32 %v937_v62, %v3130_v7  ;;  %v2557_v1 = vpop.f32.mrb[31].mxu1 }
 0xa5d   :  { %v1037_v2 = vpop.f32.mrb[32].mxu1 }
 0xa5e   :  { %v2568_v4 = vpop.f32.mrb[33].mxu1  ;;  %v1046_v6 = vsel %vm229_vm3, %v1037_v2, -inf }
 0xa5f   :  { %1047 = vmax.xlane.f32.xlu1 %v1046_v6  ;;  %v1040_v8 = vpop.f32.mrb[34].mxu1 }
 0xa60   :  { %v2569_v10 = vpop.f32.mrb[35].mxu1 }
 0xa70   :  { %1067 = vrot.lane.b32.xlu1 %v3020_v5, %s2921_s9 }
 0xa74   :  { %1217 = vrot.lane.b32.xlu1 %v3020_v5, %s2922_s10 }
 0xa78   :  { %1267 = vrot.lane.b32.xlu1 %v3023_v9, %s2922_s10 }
 0xa7c   :  { %1265 = vrot.lane.b32.xlu1 %v3023_v9, %s2923_s11 }
 0xab2   :  { %v1057_v3 = vpop.xlane.xlu0 %1056 }
 0xab3   :  { %2771 = vrcp.f32 %v1057_v3 }
 0xabd   :  { %v2772_v7 = vpop.eup %2771 }
 0xabe   :  { %v1063_v13 = vmul.f32 %v2772_v7, %v2770_v57 }
 0xac0   :  { %v1065_v17 = vpack.c.bf16 %v1063_v13, %v1063_v13 }
 0xaec   :  { %v1048_v11 = vpop.xlane.xlu1 %1047 }
 0xaed   :  { %v1050_v12 = vsub.f32 %v1037_v2, %v1048_v11 }
 0xaef   :  { %v1053_v14 = vmul.f32 1.442695, %v1050_v12 }
 0xaf0   :  { %v1068_v15 = vpop.permute.xlu1 %1067 }
 0xaf1   :  { %2773 = vpow2.f32 %v1053_v14  ;;  %v1073_v16 = vsel %vm259_vm4, %v1068_v15, 0  ;;  %v1437_v14 = vld [vmem:[#allocation7 + $0x8] sm:$0x3] }
 0xaf2   :  { %2571 = vmatpush3.bf16.msra.mxu0 %v1073_v16  ;;  %v1442_v15 = vsel %vm579_vm5, %v1437_v14, 0 }
 0xaf3   :  { %2582 = vmatprep.subr.bf16.mxu0 %v2910_v0 }
 0xaf4   :  { %v1218_v27 = vpop.permute.xlu1 %1217 }
 0xaf5   :  { %2573 = vmatmul.mubr.msk.bf16.vlgmr.msra.gmra.mrb[36].mxu0 %vm229_vm3, %v1065_v17  ;;  %v1223_v29 = vsel %vm133_vm2, %v1218_v27, 0 }
 0xaf6   :  { %2584 = vmatprep.mubr.msk.bf16.mxu0 %vm2911_vm0, %v2910_v0  ;;  %2583 = vmatpush3.bf16.msra.mxu0 %v1170_v21 }
 0xaf7   :  { %2594 = vmatprep.subr.bf16.mxu0 %v2910_v0 }
 0xaf8   :  { %v1268_v35 = vpop.permute.xlu1 %1267 }
 0xaf9   :  { %v1273_v40 = vsel %vm133_vm2, %v1268_v35, 0 }
 0xafb   :  { %v2774_v18 = vpop.eup %2773 }
 0xafc   :  { %v1058_v19 = vsel %vm229_vm3, %v2774_v18, 0.0  ;;  %v1266_v45 = vpop.permute.xlu1 %1265 }
 0xafd   :  { %1059 = vadd.xlane.f32.xlu0 %v1058_v19 }
 0xb13   :  { %1115 = vrot.lane.b32.xlu0 %v3023_v9, %s2921_s9 }
 0xb17   :  { %1215 = vrot.lane.b32.xlu0 %v3020_v5, %s2923_s11 }
 0xb8a   :  { %v1060_v22 = vpop.xlane.xlu0 %1059 }
 0xb8b   :  { %2775 = vrcp.f32 %v1060_v22 }
 0xb8e   :  { %v1116_v23 = vpop.permute.xlu0 %1115 }
 0xb8f   :  { %v1121_v24 = vsel %vm259_vm4, %v1116_v23, 0 }
 0xb90   :  { %2577 = vmatpush3.bf16.msra.mxu1 %v1121_v24 }
 0xb91   :  { %2588 = vmatprep.subr.bf16.mxu1 %v2910_v0 }
 0xb92   :  { %v1216_v30 = vpop.permute.xlu0 %1215 }
 0xb95   :  { %v2776_v25 = vpop.eup %2775 }
 0xb96   :  { %v1064_v26 = vmul.f32 %v2776_v25, %v2774_v18 }
 0xb98   :  { %v1066_v28 = vpack.c.bf16 %v1064_v26, %v1064_v26 }
 0xb9a   :  { %2579 = vmatmul.mubr.msk.bf16.vlgmr.msra.gmra.mrb[36].mxu1 %vm229_vm3, %v1066_v28 }
 0xb9b   :  { %2589 = vmatpush3.bf16.xpose.msra.mxu1 %v1223_v29  ;;  %2590 = vmatprep.mubr.msk.bf16.mxu1 %vm2911_vm0, %v2910_v0 }
 0xb9c   :  { %2600 = vmatprep.subr.bf16.mxu1 %v2910_v0 }
 0xba2   :  { %2591 = vmatmul.mubr.msk.bf16.vlgmr.msra.gmra.mrb[40].mxu1 %vm133_vm2, %v1216_v30 }
 0xba3   :  { %2602 = vmatprep.mubr.msk.bf16.mxu1 %vm2911_vm0, %v2910_v0 }
 0xbc8   :  { %v1109_v31 = vpop.f32.mrb[36].mxu0 }
 0xbc9   :  { %v2574_v32 = vpop.f32.mrb[37].mxu0 }
 0xbca   :  { %v1112_v33 = vpop.f32.mrb[38].mxu0 }
 0xbcb   :  { %v2575_v34 = vpop.f32.mrb[39].mxu0 }
 0xc6d   :  { %v1157_v36 = vpop.f32.mrb[36].mxu1 }
 0xc6e   :  { %v1163_v37 = vpack.c.bf16 %v1157_v36, %v1109_v31  ;;  %v2580_v38 = vpop.f32.mrb[37].mxu1 }
 0xc6f   :  { %v1160_v39 = vpop.f32.mrb[38].mxu1 }
 0xc70   :  { %v2581_v41 = vpop.f32.mrb[39].mxu1  ;;  %2585 = vmatmul.mubr.msk.bf16.vlgmr.msra.gmra.mrb[40].mxu0 %vm133_vm2, %v1163_v37 }
 0xc71   :  { %2595 = vmatpush3.bf16.xpose.msra.mxu0 %v1273_v40  ;;  %2596 = vmatprep.mubr.msk.bf16.mxu0 %vm2911_vm0, %v2910_v0 }
 0xc72   :  { %2606 = vmatprep.subr.bf16.mxu0 %v2910_v0 }
 0xc75   :  { %v1259_v42 = vpop.f32.mrb[40].mxu1 }
 0xc76   :  { %v2592_v43 = vpop.f32.mrb[41].mxu1  ;;  %v1315_v44 = vsel %vm229_vm3, %v1259_v42, -inf }
 0xc77   :  { %1316 = vmax.xlane.f32.xlu0 %v1315_v44  ;;  %v1262_v46 = vpop.f32.mrb[42].mxu1 }
 0xc78   :  { %v2593_v47 = vpop.f32.mrb[43].mxu1  ;;  %2597 = vmatmul.mubr.msk.bf16.vlgmr.msra.gmra.mrb[44].mxu0 %vm133_vm2, %v1266_v45 }
 0xc79   :  { %2608 = vmatprep.mubr.msk.bf16.mxu0 %vm2911_vm0, %v2910_v0 }
 0xd04   :  { %v1317_v48 = vpop.xlane.xlu0 %1316 }
 0xd05   :  { %v1321_v49 = vsub.f32 %v1259_v42, %v1317_v48 }
 0xd07   :  { %v1323_v50 = vmul.f32 1.442695, %v1321_v49 }
 0xd09   :  { %2777 = vpow2.f32 %v1323_v50 }
 0xd13   :  { %v2778_v51 = vpop.eup %2777 }
 0xd14   :  { %v1327_v52 = vsel %vm229_vm3, %v2778_v51, 0.0 }
 0xd15   :  { %1328 = vadd.xlane.f32.xlu0 %v1327_v52 }
 0xd43   :  { %v1206_v53 = vpop.f32.mrb[40].mxu0 }
 0xd44   :  { %v3206_v54 = vadd.f32 %v1206_v53, %v3165_v60  ;;  %v2586_v55 = vpop.f32.mrb[41].mxu0 }
 0xd45   :  { %v1209_v56 = vpop.f32.mrb[42].mxu0 }
 0xd46   :  { %v3209_v57 = vadd.f32 %v1209_v56, %v3168_v63  ;;  %v2587_v58 = vpop.f32.mrb[43].mxu0 }
 0xd4b   :  { %v1309_v59 = vpop.f32.mrb[44].mxu0 }
 0xd4c   :  { %v2598_v61 = vpop.f32.mrb[45].mxu0  ;;  %v1318_v62 = vsel %vm229_vm3, %v1309_v59, -inf }
 0xd4d   :  { %1319 = vmax.xlane.f32.xlu1 %v1318_v62  ;;  %v1312_v1 = vpop.f32.mrb[46].mxu0 }
 0xd4e   :  { %v2599_v2 = vpop.f32.mrb[47].mxu0 }
 0xd5e   :  { %1339 = vrot.lane.b32.xlu1 %v3020_v5, %s2924_s12 }
 0xd62   :  { %1489 = vrot.lane.b32.xlu1 %v3020_v5, %s2925_s1 }
 0xd66   :  { %1539 = vrot.lane.b32.xlu1 %v3023_v9, %s2925_s1 }
 0xd6a   :  { %1537 = vrot.lane.b32.xlu1 %v3023_v9, %s2926_s13 }
 0xda2   :  { %v1329_v60 = vpop.xlane.xlu0 %1328 }
 0xda3   :  { %2779 = vrcp.f32 %v1329_v60 }
 0xdad   :  { %v2780_v63 = vpop.eup %2779 }
 0xdae   :  { %v1335_v8 = vmul.f32 %v2780_v63, %v2778_v51 }
 0xdb0   :  { %v1337_v11 = vpack.c.bf16 %v1335_v8, %v1335_v8 }
 0xdda   :  { %v1320_v4 = vpop.xlane.xlu1 %1319 }
 0xddb   :  { %v1322_v6 = vsub.f32 %v1309_v59, %v1320_v4 }
 0xddd   :  { %v1325_v10 = vmul.f32 1.442695, %v1322_v6 }
 0xdde   :  { %v1340_v3 = vpop.permute.xlu1 %1339 }
 0xddf   :  { %2781 = vpow2.f32 %v1325_v10  ;;  %v1345_v7 = vsel %vm259_vm4, %v1340_v3, 0  ;;  %v1709_v10 = vld [vmem:[#allocation7 + $0xa] sm:$0x3] }
 0xde0   :  { %2601 = vmatpush3.bf16.msra.mxu1 %v1345_v7  ;;  %v1714_v3 = vsel %vm579_vm5, %v1709_v10, 0 }
 0xde1   :  { %2612 = vmatprep.subr.bf16.mxu1 %v2910_v0 }
 0xde2   :  { %v1490_v21 = vpop.permute.xlu1 %1489 }
 0xde3   :  { %2603 = vmatmul.mubr.msk.bf16.vlgmr.msra.gmra.mrb[44].mxu1 %vm229_vm3, %v1337_v11  ;;  %v1495_v23 = vsel %vm133_vm2, %v1490_v21, 0 }
 0xde4   :  { %2614 = vmatprep.mubr.msk.bf16.mxu1 %vm2911_vm0, %v2910_v0  ;;  %2613 = vmatpush3.bf16.msra.mxu1 %v1442_v15 }
 0xde5   :  { %2624 = vmatprep.subr.bf16.mxu1 %v2910_v0 }
 0xde6   :  { %v1540_v29 = vpop.permute.xlu1 %1539 }
 0xde7   :  { %v1545_v34 = vsel %vm133_vm2, %v1540_v29, 0 }
 0xde9   :  { %v2782_v12 = vpop.eup %2781 }
 0xdea   :  { %v1330_v13 = vsel %vm229_vm3, %v2782_v12, 0.0  ;;  %v1538_v39 = vpop.permute.xlu1 %1537 }
 0xdeb   :  { %1331 = vadd.xlane.f32.xlu0 %v1330_v13 }
 0xe01   :  { %1387 = vrot.lane.b32.xlu0 %v3023_v9, %s2924_s12 }
 0xe05   :  { %1487 = vrot.lane.b32.xlu0 %v3020_v5, %s2926_s13 }
 0xe78   :  { %v1332_v16 = vpop.xlane.xlu0 %1331 }
 0xe79   :  { %2783 = vrcp.f32 %v1332_v16 }
 0xe7c   :  { %v1388_v17 = vpop.permute.xlu0 %1387 }
 0xe7d   :  { %v1393_v18 = vsel %vm259_vm4, %v1388_v17, 0 }
 0xe7e   :  { %2607 = vmatpush3.bf16.msra.mxu0 %v1393_v18 }
 0xe7f   :  { %2618 = vmatprep.subr.bf16.mxu0 %v2910_v0 }
 0xe80   :  { %v1488_v24 = vpop.permute.xlu0 %1487 }
 0xe83   :  { %v2784_v19 = vpop.eup %2783 }
 0xe84   :  { %v1336_v20 = vmul.f32 %v2784_v19, %v2782_v12 }
 0xe86   :  { %v1338_v22 = vpack.c.bf16 %v1336_v20, %v1336_v20 }
 0xe88   :  { %2609 = vmatmul.mubr.msk.bf16.vlgmr.msra.gmra.mrb[48].mxu0 %vm229_vm3, %v1338_v22 }
 0xe89   :  { %2619 = vmatpush3.bf16.xpose.msra.mxu0 %v1495_v23  ;;  %2620 = vmatprep.mubr.msk.bf16.mxu0 %vm2911_vm0, %v2910_v0 }
 0xe8a   :  { %2630 = vmatprep.subr.bf16.mxu0 %v2910_v0 }
 0xe90   :  { %2621 = vmatmul.mubr.msk.bf16.vlgmr.msra.gmra.mrb[52].mxu0 %vm133_vm2, %v1488_v24 }
 0xe91   :  { %2632 = vmatprep.mubr.msk.bf16.mxu0 %vm2911_vm0, %v2910_v0 }
 0xeb6   :  { %v1381_v25 = vpop.f32.mrb[44].mxu1 }
 0xeb7   :  { %v2604_v26 = vpop.f32.mrb[45].mxu1 }
 0xeb8   :  { %v1384_v27 = vpop.f32.mrb[46].mxu1 }
 0xeb9   :  { %v2605_v28 = vpop.f32.mrb[47].mxu1 }
 0xf5b   :  { %v1429_v30 = vpop.f32.mrb[48].mxu0 }
 0xf5c   :  { %v1435_v31 = vpack.c.bf16 %v1429_v30, %v1381_v25  ;;  %v2610_v32 = vpop.f32.mrb[49].mxu0 }
 0xf5d   :  { %v1432_v33 = vpop.f32.mrb[50].mxu0 }
 0xf5e   :  { %v2611_v35 = vpop.f32.mrb[51].mxu0  ;;  %2615 = vmatmul.mubr.msk.bf16.vlgmr.msra.gmra.mrb[48].mxu1 %vm133_vm2, %v1435_v31 }
 0xf5f   :  { %2625 = vmatpush3.bf16.xpose.msra.mxu1 %v1545_v34  ;;  %2626 = vmatprep.mubr.msk.bf16.mxu1 %vm2911_vm0, %v2910_v0 }
 0xf60   :  { %2636 = vmatprep.subr.bf16.mxu1 %v2910_v0 }
 0xf63   :  { %v1531_v36 = vpop.f32.mrb[52].mxu0 }
 0xf64   :  { %v2622_v37 = vpop.f32.mrb[53].mxu0  ;;  %v1587_v38 = vsel %vm229_vm3, %v1531_v36, -inf }
 0xf65   :  { %1588 = vmax.xlane.f32.xlu0 %v1587_v38  ;;  %v1534_v40 = vpop.f32.mrb[54].mxu0 }
 0xf66   :  { %v2623_v41 = vpop.f32.mrb[55].mxu0  ;;  %2627 = vmatmul.mubr.msk.bf16.vlgmr.msra.gmra.mrb[52].mxu1 %vm133_vm2, %v1538_v39 }
 0xf67   :  { %2638 = vmatprep.mubr.msk.bf16.mxu1 %vm2911_vm0, %v2910_v0 }
 0xff2   :  { %v1589_v42 = vpop.xlane.xlu0 %1588 }
 0xff3   :  { %v1593_v43 = vsub.f32 %v1531_v36, %v1589_v42 }
 0xff5   :  { %v1595_v44 = vmul.f32 1.442695, %v1593_v43 }
 0xff7   :  { %2785 = vpow2.f32 %v1595_v44 }
0x1001   :  { %v2786_v45 = vpop.eup %2785 }
0x1002   :  { %v1599_v46 = vsel %vm229_vm3, %v2786_v45, 0.0 }
0x1003   :  { %1600 = vadd.xlane.f32.xlu0 %v1599_v46 }
0x1031   :  { %v1478_v47 = vpop.f32.mrb[48].mxu1 }
0x1032   :  { %v3247_v48 = vadd.f32 %v1478_v47, %v3206_v54  ;;  %v2616_v49 = vpop.f32.mrb[49].mxu1 }
0x1033   :  { %v1481_v50 = vpop.f32.mrb[50].mxu1 }
0x1034   :  { %v3250_v51 = vadd.f32 %v1481_v50, %v3209_v57  ;;  %v2617_v52 = vpop.f32.mrb[51].mxu1 }
0x1039   :  { %v1581_v53 = vpop.f32.mrb[52].mxu1 }
0x103a   :  { %v2628_v55 = vpop.f32.mrb[53].mxu1  ;;  %v1590_v56 = vsel %vm229_vm3, %v1581_v53, -inf }
0x103b   :  { %1591 = vmax.xlane.f32.xlu1 %v1590_v56  ;;  %v1584_v58 = vpop.f32.mrb[54].mxu1 }
0x103c   :  { %v2629_v59 = vpop.f32.mrb[55].mxu1 }
0x104c   :  { %1611 = vrot.lane.b32.xlu1 %v3020_v5, %s2927_s14 }
0x1050   :  { %1761 = vrot.lane.b32.xlu1 %v3020_v5, %s2928_s15 }
0x1054   :  { %1811 = vrot.lane.b32.xlu1 %v3023_v9, %s2928_s15 }
0x1058   :  { %1809 = vrot.lane.b32.xlu1 %v3023_v9, %s2929_s16 }
0x1090   :  { %v1601_v54 = vpop.xlane.xlu0 %1600 }
0x1091   :  { %2787 = vrcp.f32 %v1601_v54 }
0x109b   :  { %v2788_v57 = vpop.eup %2787 }
0x109c   :  { %v1607_v1 = vmul.f32 %v2788_v57, %v2786_v45 }
0x109e   :  { %v1609_v4 = vpack.c.bf16 %v1607_v1, %v1607_v1 }
0x10c8   :  { %v1592_v61 = vpop.xlane.xlu1 %1591 }
0x10c9   :  { %v1594_v62 = vsub.f32 %v1581_v53, %v1592_v61 }
0x10cb   :  { %v1597_v2 = vmul.f32 1.442695, %v1594_v62 }
0x10cc   :  { %v1612_v60 = vpop.permute.xlu1 %1611 }
0x10cd   :  { %2789 = vpow2.f32 %v1597_v2  ;;  %v1617_v63 = vsel %vm259_vm4, %v1612_v60, 0  ;;  %v1981_v2 = vld [vmem:[#allocation7 + $0xc] sm:$0x3] }
0x10ce   :  { %2631 = vmatpush3.bf16.msra.mxu0 %v1617_v63  ;;  %v1986_v60 = vsel %vm579_vm5, %v1981_v2, 0 }
0x10cf   :  { %2642 = vmatprep.subr.bf16.mxu0 %v2910_v0 }
0x10d0   :  { %v1762_v15 = vpop.permute.xlu1 %1761 }
0x10d1   :  { %2633 = vmatmul.mubr.msk.bf16.vlgmr.msra.gmra.mrb[56].mxu0 %vm229_vm3, %v1609_v4  ;;  %v1767_v17 = vsel %vm133_vm2, %v1762_v15, 0 }
0x10d2   :  { %2644 = vmatprep.mubr.msk.bf16.mxu0 %vm2911_vm0, %v2910_v0  ;;  %2643 = vmatpush3.bf16.msra.mxu0 %v1714_v3 }
0x10d3   :  { %2654 = vmatprep.subr.bf16.mxu0 %v2910_v0 }
0x10d4   :  { %v1812_v23 = vpop.permute.xlu1 %1811 }
0x10d5   :  { %v1817_v28 = vsel %vm133_vm2, %v1812_v23, 0 }
0x10d7   :  { %v2790_v6 = vpop.eup %2789 }
0x10d8   :  { %v1602_v8 = vsel %vm229_vm3, %v2790_v6, 0.0  ;;  %v1810_v33 = vpop.permute.xlu1 %1809 }
0x10d9   :  { %1603 = vadd.xlane.f32.xlu0 %v1602_v8 }
0x10ef   :  { %1659 = vrot.lane.b32.xlu0 %v3023_v9, %s2927_s14 }
0x10f3   :  { %1759 = vrot.lane.b32.xlu0 %v3020_v5, %s2929_s16 }
0x1166   :  { %v1604_v7 = vpop.xlane.xlu0 %1603 }
0x1167   :  { %2791 = vrcp.f32 %v1604_v7 }
0x116a   :  { %v1660_v11 = vpop.permute.xlu0 %1659 }
0x116b   :  { %v1665_v12 = vsel %vm259_vm4, %v1660_v11, 0 }
0x116c   :  { %2637 = vmatpush3.bf16.msra.mxu1 %v1665_v12 }
0x116d   :  { %2648 = vmatprep.subr.bf16.mxu1 %v2910_v0 }
0x116e   :  { %v1760_v18 = vpop.permute.xlu0 %1759 }
0x1171   :  { %v2792_v13 = vpop.eup %2791 }
0x1172   :  { %v1608_v14 = vmul.f32 %v2792_v13, %v2790_v6 }
0x1174   :  { %v1610_v16 = vpack.c.bf16 %v1608_v14, %v1608_v14 }
0x1176   :  { %2639 = vmatmul.mubr.msk.bf16.vlgmr.msra.gmra.mrb[56].mxu1 %vm229_vm3, %v1610_v16 }
0x1177   :  { %2649 = vmatpush3.bf16.xpose.msra.mxu1 %v1767_v17  ;;  %2650 = vmatprep.mubr.msk.bf16.mxu1 %vm2911_vm0, %v2910_v0 }
0x1178   :  { %2660 = vmatprep.subr.bf16.mxu1 %v2910_v0 }
0x117e   :  { %2651 = vmatmul.mubr.msk.bf16.vlgmr.msra.gmra.mrb[60].mxu1 %vm133_vm2, %v1760_v18 }
0x117f   :  { %2662 = vmatprep.mubr.msk.bf16.mxu1 %vm2911_vm0, %v2910_v0 }
0x11a4   :  { %v1653_v19 = vpop.f32.mrb[56].mxu0 }
0x11a5   :  { %v2634_v20 = vpop.f32.mrb[57].mxu0 }
0x11a6   :  { %v1656_v21 = vpop.f32.mrb[58].mxu0 }
0x11a7   :  { %v2635_v22 = vpop.f32.mrb[59].mxu0 }
0x1249   :  { %v1701_v24 = vpop.f32.mrb[56].mxu1 }
0x124a   :  { %v1707_v25 = vpack.c.bf16 %v1701_v24, %v1653_v19  ;;  %v2640_v26 = vpop.f32.mrb[57].mxu1 }
0x124b   :  { %v1704_v27 = vpop.f32.mrb[58].mxu1 }
0x124c   :  { %v2641_v29 = vpop.f32.mrb[59].mxu1  ;;  %2645 = vmatmul.mubr.msk.bf16.vlgmr.msra.gmra.mrb[60].mxu0 %vm133_vm2, %v1707_v25 }
0x124d   :  { %2655 = vmatpush3.bf16.xpose.msra.mxu0 %v1817_v28  ;;  %2656 = vmatprep.mubr.msk.bf16.mxu0 %vm2911_vm0, %v2910_v0 }
0x124e   :  { %2666 = vmatprep.subr.bf16.mxu0 %v2910_v0 }
0x1251   :  { %v1803_v30 = vpop.f32.mrb[60].mxu1 }
0x1252   :  { %v2652_v31 = vpop.f32.mrb[61].mxu1  ;;  %v1859_v32 = vsel %vm229_vm3, %v1803_v30, -inf }
0x1253   :  { %1860 = vmax.xlane.f32.xlu0 %v1859_v32  ;;  %v1806_v34 = vpop.f32.mrb[62].mxu1 }
0x1254   :  { %v2653_v35 = vpop.f32.mrb[63].mxu1  ;;  %2657 = vmatmul.mubr.msk.bf16.vlgmr.msra.gmra.mrb[64].mxu0 %vm133_vm2, %v1810_v33 }
0x1255   :  { %2668 = vmatprep.mubr.msk.bf16.mxu0 %vm2911_vm0, %v2910_v0 }
0x12e0   :  { %v1861_v36 = vpop.xlane.xlu0 %1860 }
0x12e1   :  { %v1865_v37 = vsub.f32 %v1803_v30, %v1861_v36 }
0x12e3   :  { %v1867_v38 = vmul.f32 1.442695, %v1865_v37 }
0x12e5   :  { %2793 = vpow2.f32 %v1867_v38 }
0x12ef   :  { %v2794_v39 = vpop.eup %2793 }
0x12f0   :  { %v1871_v40 = vsel %vm229_vm3, %v2794_v39, 0.0 }
0x12f1   :  { %1872 = vadd.xlane.f32.xlu0 %v1871_v40 }
0x131f   :  { %v1750_v41 = vpop.f32.mrb[60].mxu0 }
0x1320   :  { %v3288_v42 = vadd.f32 %v1750_v41, %v3247_v48  ;;  %v2646_v43 = vpop.f32.mrb[61].mxu0 }
0x1321   :  { %v1753_v44 = vpop.f32.mrb[62].mxu0 }
0x1322   :  { %v3291_v45 = vadd.f32 %v1753_v44, %v3250_v51  ;;  %v2647_v46 = vpop.f32.mrb[63].mxu0 }
0x1327   :  { %v1853_v47 = vpop.f32.mrb[64].mxu0 }
0x1328   :  { %v2658_v49 = vpop.f32.mrb[65].mxu0  ;;  %v1862_v50 = vsel %vm229_vm3, %v1853_v47, -inf }
0x1329   :  { %1863 = vmax.xlane.f32.xlu1 %v1862_v50  ;;  %v1856_v52 = vpop.f32.mrb[66].mxu0 }
0x132a   :  { %v2659_v53 = vpop.f32.mrb[67].mxu0 }
0x133a   :  { %1883 = vrot.lane.b32.xlu1 %v3020_v5, %s2930_s17 }
0x133e   :  { %2033 = vrot.lane.b32.xlu1 %v3020_v5, %s2931_s19 }
0x1342   :  { %2083 = vrot.lane.b32.xlu1 %v3023_v9, %s2931_s19 }
0x1346   :  { %2081 = vrot.lane.b32.xlu1 %v3023_v9, %s2932_s20 }
0x137e   :  { %v1873_v48 = vpop.xlane.xlu0 %1872 }
0x137f   :  { %2795 = vrcp.f32 %v1873_v48 }
0x1389   :  { %v2796_v51 = vpop.eup %2795 }
0x138a   :  { %v1879_v58 = vmul.f32 %v2796_v51, %v2794_v39 }
0x138c   :  { %v1881_v61 = vpack.c.bf16 %v1879_v58, %v1879_v58  ;;  %v2253_v58 = vld [vmem:[#allocation7 + $0xe] sm:$0x3] }
0x13b6   :  { %v1864_v55 = vpop.xlane.xlu1 %1863 }
0x13b7   :  { %v1866_v56 = vsub.f32 %v1853_v47, %v1864_v55 }
0x13b9   :  { %v1869_v59 = vmul.f32 1.442695, %v1866_v56 }
0x13ba   :  { %v1884_v54 = vpop.permute.xlu1 %1883 }
0x13bb   :  { %2797 = vpow2.f32 %v1869_v59  ;;  %v1889_v57 = vsel %vm259_vm4, %v1884_v54, 0  ;;  %v2258_v59 = vsel %vm579_vm5, %v2253_v58, 0 }
0x13bc   :  { %2661 = vmatpush3.bf16.msra.mxu1 %v1889_v57 }
0x13bd   :  { %2672 = vmatprep.subr.bf16.mxu1 %v2910_v0 }
0x13be   :  { %v2034_v3 = vpop.permute.xlu1 %2033 }
0x13bf   :  { %2663 = vmatmul.mubr.msk.bf16.vlgmr.msra.gmra.mrb[64].mxu1 %vm229_vm3, %v1881_v61  ;;  %v2039_v11 = vsel %vm133_vm2, %v2034_v3, 0 }
0x13c0   :  { %2674 = vmatprep.mubr.msk.bf16.mxu1 %vm2911_vm0, %v2910_v0  ;;  %2673 = vmatpush3.bf16.msra.mxu1 %v1986_v60 }
0x13c1   :  { %2684 = vmatprep.subr.bf16.mxu1 %v2910_v0 }
0x13c2   :  { %v2084_v17 = vpop.permute.xlu1 %2083 }
0x13c3   :  { %v2089_v22 = vsel %vm133_vm2, %v2084_v17, 0 }
0x13c5   :  { %v2798_v62 = vpop.eup %2797 }
0x13c6   :  { %v1874_v1 = vsel %vm229_vm3, %v2798_v62, 0.0  ;;  %v2082_v27 = vpop.permute.xlu1 %2081 }
0x13c7   :  { %1875 = vadd.xlane.f32.xlu0 %v1874_v1 }
0x13dd   :  { %1931 = vrot.lane.b32.xlu0 %v3023_v9, %s2930_s17 }
0x13e1   :  { %2031 = vrot.lane.b32.xlu0 %v3020_v5, %s2932_s20 }
0x1454   :  { %v1876_v63 = vpop.xlane.xlu0 %1875 }
0x1455   :  { %2799 = vrcp.f32 %v1876_v63 }
0x1458   :  { %v1932_v4 = vpop.permute.xlu0 %1931 }
0x1459   :  { %v1937_v6 = vsel %vm259_vm4, %v1932_v4, 0 }
0x145a   :  { %2667 = vmatpush3.bf16.msra.mxu0 %v1937_v6 }
0x145b   :  { %2678 = vmatprep.subr.bf16.mxu0 %v2910_v0 }
0x145c   :  { %v2032_v12 = vpop.permute.xlu0 %2031 }
0x145f   :  { %v2800_v8 = vpop.eup %2799 }
0x1460   :  { %v1880_v10 = vmul.f32 %v2800_v8, %v2798_v62 }
0x1462   :  { %v1882_v7 = vpack.c.bf16 %v1880_v10, %v1880_v10 }
0x1464   :  { %2669 = vmatmul.mubr.msk.bf16.vlgmr.msra.gmra.mrb[68].mxu0 %vm229_vm3, %v1882_v7 }
0x1465   :  { %2679 = vmatpush3.bf16.xpose.msra.mxu0 %v2039_v11  ;;  %2680 = vmatprep.mubr.msk.bf16.mxu0 %vm2911_vm0, %v2910_v0  ;;  %v2376_v11 = vld [vmem:[%s3363_s3] ss:$0 sm:$0xff] }
0x1466   :  { %2690 = vmatprep.subr.bf16.mxu0 %v2910_v0 }
0x146c   :  { %2681 = vmatmul.mubr.msk.bf16.vlgmr.msra.gmra.mrb[72].mxu0 %vm133_vm2, %v2032_v12 }
0x146d   :  { %2692 = vmatprep.mubr.msk.bf16.mxu0 %vm2911_vm0, %v2910_v0 }
0x1492   :  { %v1925_v13 = vpop.f32.mrb[64].mxu1 }
0x1493   :  { %v2664_v14 = vpop.f32.mrb[65].mxu1 }
0x1494   :  { %v1928_v15 = vpop.f32.mrb[66].mxu1 }
0x1495   :  { %v2665_v16 = vpop.f32.mrb[67].mxu1 }
0x1537   :  { %v1973_v18 = vpop.f32.mrb[68].mxu0 }
0x1538   :  { %v1979_v19 = vpack.c.bf16 %v1973_v18, %v1925_v13  ;;  %v2670_v20 = vpop.f32.mrb[69].mxu0 }
0x1539   :  { %v1976_v21 = vpop.f32.mrb[70].mxu0 }
0x153a   :  { %v2671_v23 = vpop.f32.mrb[71].mxu0  ;;  %2675 = vmatmul.mubr.msk.bf16.vlgmr.msra.gmra.mrb[68].mxu1 %vm133_vm2, %v1979_v19 }
0x153b   :  { %2685 = vmatpush3.bf16.xpose.msra.mxu1 %v2089_v22  ;;  %2686 = vmatprep.mubr.msk.bf16.mxu1 %vm2911_vm0, %v2910_v0 }
0x153c   :  { %2696 = vmatprep.subr.bf16.mxu1 %v2910_v0 }
0x153f   :  { %v2075_v24 = vpop.f32.mrb[72].mxu0 }
0x1540   :  { %v2682_v25 = vpop.f32.mrb[73].mxu0  ;;  %v2131_v26 = vsel %vm229_vm3, %v2075_v24, -inf }
0x1541   :  { %2132 = vmax.xlane.f32.xlu0 %v2131_v26  ;;  %v2078_v28 = vpop.f32.mrb[74].mxu0 }
0x1542   :  { %v2683_v29 = vpop.f32.mrb[75].mxu0  ;;  %2687 = vmatmul.mubr.msk.bf16.vlgmr.msra.gmra.mrb[72].mxu1 %vm133_vm2, %v2082_v27 }
0x1543   :  { %2698 = vmatprep.mubr.msk.bf16.mxu1 %vm2911_vm0, %v2910_v0 }
0x15ce   :  { %v2133_v30 = vpop.xlane.xlu0 %2132 }
0x15cf   :  { %v2137_v31 = vsub.f32 %v2075_v24, %v2133_v30 }
0x15d1   :  { %v2139_v32 = vmul.f32 1.442695, %v2137_v31 }
0x15d3   :  { %2801 = vpow2.f32 %v2139_v32 }
0x15dd   :  { %v2802_v33 = vpop.eup %2801 }
0x15de   :  { %v2143_v34 = vsel %vm229_vm3, %v2802_v33, 0.0 }
0x15df   :  { %2144 = vadd.xlane.f32.xlu0 %v2143_v34 }
0x160d   :  { %v2022_v35 = vpop.f32.mrb[68].mxu1 }
0x160e   :  { %v2029_v36 = vadd.f32 %v2022_v35, %v3288_v42  ;;  %v2676_v37 = vpop.f32.mrb[69].mxu1 }
0x160f   :  { %v2025_v38 = vpop.f32.mrb[70].mxu1 }
0x1610   :  { %v2030_v39 = vadd.f32 %v2025_v38, %v3291_v45  ;;  %v2677_v40 = vpop.f32.mrb[71].mxu1 }
0x1615   :  { %v2125_v41 = vpop.f32.mrb[72].mxu1 }
0x1616   :  { %v2688_v43 = vpop.f32.mrb[73].mxu1  ;;  %v2134_v44 = vsel %vm229_vm3, %v2125_v41, -inf }
0x1617   :  { %2135 = vmax.xlane.f32.xlu1 %v2134_v44  ;;  %v2128_v46 = vpop.f32.mrb[74].mxu1 }
0x1618   :  { %v2689_v47 = vpop.f32.mrb[75].mxu1 }
0x1628   :  { %2155 = vrot.lane.b32.xlu1 %v3020_v5, %s2933_s21 }
0x166c   :  { %v2145_v49 = vpop.xlane.xlu0 %2144 }
0x166d   :  { %2803 = vrcp.f32 %v2145_v49 }
0x1677   :  { %v2804_v50 = vpop.eup %2803 }
0x1678   :  { %v2151_v53 = vmul.f32 %v2804_v50, %v2802_v33 }
0x167a   :  { %v2153_v55 = vpack.c.bf16 %v2151_v53, %v2151_v53 }
0x16a4   :  { %v2136_v52 = vpop.xlane.xlu1 %2135 }
0x16a5   :  { %v2138_v42 = vsub.f32 %v2125_v41, %v2136_v52 }
0x16a7   :  { %v2141_v48 = vmul.f32 1.442695, %v2138_v42 }
0x16a8   :  { %v2156_v51 = vpop.permute.xlu1 %2155 }
0x16a9   :  { %2805 = vpow2.f32 %v2141_v48  ;;  %v2161_v45 = vsel %vm259_vm4, %v2156_v51, 0 }
0x16aa   :  { %2691 = vmatpush3.bf16.msra.mxu0 %v2161_v45 }
0x16ab   :  { %2702 = vmatprep.subr.bf16.mxu0 %v2910_v0 }
0x16ad   :  { %2693 = vmatmul.mubr.msk.bf16.vlgmr.msra.gmra.mrb[76].mxu0 %vm229_vm3, %v2153_v55 }
0x16ae   :  { %2704 = vmatprep.mubr.msk.bf16.mxu0 %vm2911_vm0, %v2910_v0  ;;  %2703 = vmatpush3.bf16.msra.mxu0 %v2258_v59 }
0x16b3   :  { %v2806_v5 = vpop.eup %2805 }
0x16b4   :  { %v2146_v56 = vsel %vm229_vm3, %v2806_v5, 0.0 }
0x16b5   :  { %2147 = vadd.xlane.f32.xlu0 %v2146_v56 }
0x16cb   :  { %2203 = vrot.lane.b32.xlu0 %v3023_v9, %s2933_s21 }
0x1742   :  { %v2148_v54 = vpop.xlane.xlu0 %2147 }
0x1743   :  { %2807 = vrcp.f32 %v2148_v54 }
0x1746   :  { %v2204_v57 = vpop.permute.xlu0 %2203 }
0x1747   :  { %v2209_v61 = vsel %vm259_vm4, %v2204_v57, 0 }
0x1748   :  { %2697 = vmatpush3.bf16.msra.mxu1 %v2209_v61 }
0x174d   :  { %v2808_v62 = vpop.eup %2807 }
0x174e   :  { %v2152_v1 = vmul.f32 %v2808_v62, %v2806_v5 }
0x1750   :  { %v2154_v2 = vpack.c.bf16 %v2152_v1, %v2152_v1 }
0x1752   :  { %2699 = vmatmul.mubr.msk.bf16.vlgmr.msra.gmra.mrb[76].mxu1 %vm229_vm3, %v2154_v2 }
0x1780   :  { %v2197_v0 = vpop.f32.mrb[76].mxu0 }
0x1781   :  { %v2694_v60 = vpop.f32.mrb[77].mxu0 }
0x1782   :  { %v2200_v63 = vpop.f32.mrb[78].mxu0 }
0x1783   :  { %v2695_v4 = vpop.f32.mrb[79].mxu0 }
0x1825   :  { %v2245_v9 = vpop.f32.mrb[76].mxu1 }
0x1826   :  { %v2251_v6 = vpack.c.bf16 %v2245_v9, %v2197_v0  ;;  %v2700_v8 = vpop.f32.mrb[77].mxu1 }
0x1827   :  { %v2248_v10 = vpop.f32.mrb[78].mxu1 }
0x1828   :  { %v2701_v3 = vpop.f32.mrb[79].mxu1  ;;  %2705 = vmatmul.mubr.msk.bf16.vlgmr.msra.gmra.mrb[80].mxu0 %vm133_vm2, %v2251_v6 }
0x18fb   :  { %v2294_v7 = vpop.f32.mrb[80].mxu0 }
0x18fc   :  { %v2301_v12 = vadd.f32 %v2294_v7, %v2029_v36  ;;  %v2706_v13 = vpop.f32.mrb[81].mxu0 }
0x18fd   :  { %v2297_v14 = vpop.f32.mrb[82].mxu0 }
0x18fe   :  { %v2310_v15 = vadd.f32 %v2376_v11, %v2301_v12  ;;  %v2302_v16 = vadd.f32 %v2297_v14, %v2030_v39  ;;  %v2707_v17 = vpop.f32.mrb[83].mxu0 }
0x1900   :  { %2312 = vst.msk [vmem:[#allocation8] sm:$0xff] %vm83_vm1, %v2310_v15  ;;  %v2311_v18 = vadd.f32 %v2376_v11, %v2302_v16 }
0x1902   :  { %2313 = vst.msk [vmem:[#allocation8 + $0x8] sm:$0xff] %vm83_vm1, %v2311_v18 }
0x1903   :  { %2886 = shalt.err (!%p2883_p0)
}
0x1904   :  { %s2887_s26 = scalar_lea.hbm %s3364_s4, 256 }
0x1905   :  { %p2888_p1 = scmp.ne.s32.totalorder %s3364_s4, %s2887_s26  ;;  %p2891_p2 = scmp.lt.u32.totalorder %s2887_s26, %s3364_s4 }
0x1907   :  { %p2893_p3 = pnand %p2891_p2, %p2888_p1 }
0x1909   :  { %2896 = shalt.err (!%p2893_p3)
}
0x190a   :  { %s2935_s30 = smov 128   ;;  %s2936_s5 = smov 8  }
0x190b   :  { %2325 = dma.vmem_to_hbm [thread:$0]  %s2320_s0, 256, %s3364_s4, [#allocation4], %s2935_s30, %s2935_s30, %s2936_s5  }
0x190c   :  { %2901 = dma.done.wait [#allocation4], 256  }
0x190d   :  { %2902 = vsyncadd [#allocation4], 4294967040 }
0x190e   :  { %2329 = vsyncpa [#allocation3], 1 }
0x190f   :  { %2330 = vsyncpa [#allocation6], 1 }
0x1910   :  { %2331 = vsyncpa [#allocation4], 1 }

</bundles_post_ra>
